<compile_context>
chip_gen: v5e
topology: v5e:2x2
jax: 0.10.0
libtpu: 0.0.40
codegen_flags: <defaults>
</compile_context>

<pallas_src>
import jax
import jax.numpy as jnp
from jax.experimental import pallas as pl
from jax.experimental.pallas import tpu as pltpu

TOTAL_AA_MASS = lambda m_z, charge: (m_z - 1.00727646688) * charge - 18.010565

LANE = 128
_NEG = -1e30                     # mask value for padded vocab columns (never wins argmax)
_MAX_B_BLOCK = 512               # spectra per grid step
_VMEM_LIMIT = 32 * 1024 * 1024   # covers v5e's smaller scoped-VMEM default; safe on v6e/v7x


def _round_up(x, m):
    return ((x + m - 1) // m) * m


def _cdiv(a, b):
    return (a + b - 1) // b


# --------------------------------------------------------------------------
# Fused forward kernel: encoder -> pool -> decoder head -> argmax -> mass sum
# --------------------------------------------------------------------------

def _fused_forward_kernel(mz_ref, ab_ref, len_ref, w1_ref, b1_ref, w2_ref, b2_ref,
                          wo_ref, posb_ref, masses_ref,
                          seqs_ref, logits_ref, mass_ref):
    # mz/ab: (B, S) f32     len: (B, 1) f32 (valid-peak count)
    # w1: (2, Hp) f32       b1: (1, Hp) f32      w2: (Hp, Hp) f32   b2: (1, Hp) f32
    # wo: (Hp, Vp) f32      posb: (L, Vp) f32 (pos @ wo + bo, padded vocab = -1e30)
    # masses: (1, Vp) f32 (padded vocab = 0)
    # seqs: (B, L) i32      logits: (B, L, Vp) bf16     mass: (B, 1) f32
    mz = mz_ref[...]
    ab = ab_ref[...]
    length = len_ref[...]                                           # (B, 1)
    B, S = mz.shape
    Hp = b1_ref.shape[1]

    w1a = w1_ref[0:1, :]                                            # (1, Hp)
    w1b = w1_ref[1:2, :]                                            # (1, Hp)
    b1 = b1_ref[...]                                                # (1, Hp)

    # --- encoder layer 1 + masked mean-pool, fused: unrolled loop over the S peaks keeps a
    #     single (B, Hp) accumulator; the (B, S, Hp) intermediate is never materialized.
    acc = jnp.zeros((B, Hp), jnp.float32)
    for s in range(S):                                              # S is small & static
        valid = (length > float(s)).astype(jnp.float32)             # (B, 1): mask padded peaks
        h = jnp.maximum(mz[:, s:s + 1] * w1a + ab[:, s:s + 1] * w1b + b1, 0.0)  # (B, Hp)
        acc = acc + valid * h
    pooled_h1 = acc * (1.0 / jnp.maximum(length, 1.0))              # masked mean over peaks

    # --- encoder layer 2 (linear) applied to the pooled state (mean commutes with matmul) ---
    pooled = jnp.dot(pooled_h1, w2_ref[...],
                     preferred_element_type=jnp.float32) + b2_ref[...]          # (B, Hp)

    # --- decoder head: logits[b, l, :] = pooled[b] @ wo + (pos[l] @ wo + bo) ---
    plog = jnp.dot(pooled, wo_ref[...], preferred_element_type=jnp.float32)     # (B, Vp)
    logits = plog[:, None, :] + posb_ref[...][None, :, :]                       # (B, L, Vp) f32
    logits_ref[...] = logits.astype(logits_ref.dtype)                           # bf16 writeback

    # --- argmax over (padded) vocab, first-occurrence tie-break, tiny (1,1,Vp) iota ---
    Vp = logits.shape[-1]
    vid = jax.lax.broadcasted_iota(jnp.int32, (1, 1, Vp), 2)
    mx = jnp.max(logits, axis=-1, keepdims=True)
    seqs = jnp.min(jnp.where(logits == mx, vid, Vp), axis=-1).astype(jnp.int32)  # (B, L)
    seqs_ref[...] = seqs

    # --- residue-mass gather-sum (masses[None].repeat(...).gather(1, seqs).sum(-1)) ---
    m_row = masses_ref[...][None, :, :]                                          # (1, 1, Vp)
    per_tok = jnp.sum(jnp.where(vid == seqs[:, :, None], m_row, 0.0), axis=-1)   # (B, L)
    mass_ref[...] = jnp.sum(per_tok, axis=-1, keepdims=True)                     # (B, 1)


def fused_forward(mz, ab, length, params):
    BN, S = mz.shape
    Hp = params['w1'].shape[1]
    Vp = params['wo'].shape[1]
    L = params['posb'].shape[0]

    len_col = length.astype(jnp.float32).reshape(BN, 1)

    if BN <= 16:
        B = _round_up(BN, 8)                        # single block; too small to split usefully
    else:
        # >= 2 blocks whenever possible so both v7x TensorCores get work; blocks up to 512
        # amortize per-step pipeline overhead on v5e/v6e.
        B = min(_round_up(_cdiv(BN, 2), 8), _MAX_B_BLOCK)
    BP = _round_up(BN, B)
    if BP != BN:
        pad = BP - BN
        mz = jnp.pad(mz, ((0, pad), (0, 0)))
        ab = jnp.pad(ab, ((0, pad), (0, 0)))
        len_col = jnp.pad(len_col, ((0, pad), (0, 0)))
    grid = BP // B

    seqs, logits, mass = pl.pallas_call(
        _fused_forward_kernel,
        out_shape=(
            jax.ShapeDtypeStruct((BP, L), jnp.int32),
            jax.ShapeDtypeStruct((BP, L, Vp), jnp.bfloat16),
            jax.ShapeDtypeStruct((BP, 1), jnp.float32),
        ),
        grid=(grid,),
        in_specs=[
            pl.BlockSpec((B, S), lambda i: (i, 0)),
            pl.BlockSpec((B, S), lambda i: (i, 0)),
            pl.BlockSpec((B, 1), lambda i: (i, 0)),
            pl.BlockSpec((2, Hp), lambda i: (0, 0)),
            pl.BlockSpec((1, Hp), lambda i: (0, 0)),
            pl.BlockSpec((Hp, Hp), lambda i: (0, 0)),
            pl.BlockSpec((1, Hp), lambda i: (0, 0)),
            pl.BlockSpec((Hp, Vp), lambda i: (0, 0)),
            pl.BlockSpec((L, Vp), lambda i: (0, 0)),
            pl.BlockSpec((1, Vp), lambda i: (0, 0)),
        ],
        out_specs=(
            pl.BlockSpec((B, L), lambda i: (i, 0)),
            pl.BlockSpec((B, L, Vp), lambda i: (i, 0, 0)),
            pl.BlockSpec((B, 1), lambda i: (i, 0)),
        ),
        compiler_params=pltpu.CompilerParams(
            dimension_semantics=("parallel",),
            vmem_limit_bytes=_VMEM_LIMIT),
    )(mz, ab, len_col, params['w1'], params['b1'], params['w2'], params['b2'],
      params['wo'], params['posb'], params['masses'])

    return seqs[:BN], logits[:BN], mass[:BN, 0]


# --------------------------------------------------------------------------
# Ensemble-selection kernel (batched): duplicate counts + pass/fail winner idx
# --------------------------------------------------------------------------

def _select_kernel(seqs_ref, pf_ref, o_ref):
    # seqs: (Bb, n, L) int32    pf: (Bb, 1, n) int32    o: (Bb, 1) int32
    s = seqs_ref[...]                                               # (Bb, n, L)
    Bb, n, L = s.shape
    lane = jax.lax.broadcasted_iota(jnp.int32, (1, n), 1)

    # cnt[b, j] = number of rows of spectrum b identical to row j (== torch unique counts[inv]).
    cnt = jnp.zeros((Bb, n), jnp.int32)
    for j in range(n):                                              # n = ensemble size (static)
        eq_j = (s == s[:, j:j + 1, :]).astype(jnp.int32)            # (Bb, n, L)
        same_j = (jnp.sum(eq_j, axis=-1) == L).astype(jnp.int32)    # (Bb, n): row i == row j
        cnt_j = jnp.sum(same_j, axis=-1, keepdims=True)             # (Bb, 1)
        cnt = cnt + jnp.where(lane == j, cnt_j, 0)

    pf = pf_ref[...][:, 0, :]                                       # (Bb, n)
    score = cnt * pf
    best = jnp.max(score, axis=-1, keepdims=True)
    idx_pf = jnp.min(jnp.where(score == best, lane, n), axis=-1, keepdims=True)
    bestc = jnp.max(cnt, axis=-1, keepdims=True)
    idx_cnt = jnp.min(jnp.where(cnt == bestc, lane, n), axis=-1, keepdims=True)
    all_fail = jnp.sum(pf, axis=-1, keepdims=True) == 0
    o_ref[...] = jnp.where(all_fail, idx_cnt, idx_pf)               # (Bb, 1)


def select_winners(seqs_rs, pf_rs):
    bs, n, L = seqs_rs.shape
    Bb = min(_round_up(bs, 8), 128)                                 # >= 8 spectra per grid step
    bs_p = _round_up(bs, Bb)
    if bs_p != bs:
        seqs_rs = jnp.pad(seqs_rs, ((0, bs_p - bs), (0, 0), (0, 0)))
        pf_rs = jnp.pad(pf_rs, ((0, bs_p - bs), (0, 0)))
    pf3 = pf_rs.astype(jnp.int32).reshape(bs_p, 1, n)

    add = pl.pallas_call(
        _select_kernel,
        out_shape=jax.ShapeDtypeStruct((bs_p, 1), jnp.int32),
        grid=(bs_p // Bb,),
        in_specs=[
            pl.BlockSpec((Bb, n, L), lambda b: (b, 0, 0)),
            pl.BlockSpec((Bb, 1, n), lambda b: (b, 0, 0)),
        ],
        out_specs=pl.BlockSpec((Bb, 1), lambda b: (b, 0)),
        compiler_params=pltpu.CompilerParams(dimension_semantics=("parallel",)),
    )(seqs_rs, pf3)
    return add[:bs, 0]


# --------------------------------------------------------------------------
# Model wrapper (glue in plain JAX)
# --------------------------------------------------------------------------

class Seq2SeqDiffPallas:
    def __init__(self, *, top_peaks, hidden, pep_len, vocab, ensemble_n, mass_tol, key):
        self.top_peaks = top_peaks
        self.hidden = hidden
        self.pep_len = pep_len
        self.vocab = vocab
        self.ens_size = ensemble_n
        self.mass_tol = mass_tol

        H, V, L = hidden, vocab, pep_len
        Hp, Vp = _round_up(H, LANE), _round_up(V, LANE)

        k1, k2, k3, k4 = jax.random.split(key, 4)
        # TODO(synk): Encoder architecture (attention / use_charge / use_mass) not provided;
        # deterministic 2-layer MLP encoder (length-masked mean pooling) used as stand-in.
        w1 = jax.random.normal(k1, (2, H), jnp.float32) * 0.5
        b1 = jnp.zeros((1, H), jnp.float32)
        w2 = jax.random.normal(k2, (H, H), jnp.float32) * (H ** -0.5)
        b2 = jnp.zeros((1, H), jnp.float32)
        # TODO(synk): DenovoDiffusionDecoder / create_diffusion sampling loop not provided;
        # single-shot positional logit head used as stand-in (linear, so pos@wo+bo is folded).
        pos = jax.random.normal(k3, (L, H), jnp.float32) * 0.1
        wo = jax.random.normal(k4, (H, V), jnp.float32) * (H ** -0.5)
        bo = jnp.zeros((1, V), jnp.float32)
        # TODO(synk): masses.tsv not readable here; deterministic synthetic residue-mass table.
        masses = jnp.concatenate(
            [jnp.zeros((1,), jnp.float32),
             57.02146 + 7.3 * jnp.arange(V - 1, dtype=jnp.float32)])

        posb = pos @ wo + bo                                               # (L, V) f32
        # All weights stay f32 (MXU is nearly idle; avoids bf16 argmax flips on near-ties).
        self.params = {
            'w1': jnp.zeros((2, Hp), jnp.float32).at[:, :H].set(w1),
            'b1': jnp.zeros((1, Hp), jnp.float32).at[:, :H].set(b1),
            'w2': jnp.zeros((Hp, Hp), jnp.float32).at[:H, :H].set(w2),
            'b2': jnp.zeros((1, Hp), jnp.float32).at[:, :H].set(b2),
            'wo': jnp.zeros((Hp, Vp), jnp.float32).at[:H, :V].set(wo),
            'posb': jnp.full((L, Vp), _NEG, jnp.float32).at[:, :V].set(posb),
            'masses': jnp.zeros((1, Vp), jnp.float32).at[0, :V].set(masses),
        }

    # --- Seq2SeqDiff.forward (encoder + decoder fused into one Pallas call) ---
    def forward(self, batch):
        seqs, logits_p, _ = fused_forward(batch['mz'], batch['ab'], batch['length'], self.params)
        return seqs, logits_p[:, :, :self.vocab]

    # --- Seq2SeqDiff.expand_batch ---
    def expand_batch(self, batch, n=None):
        n = self.ens_size if n is None else n
        bs, sl = batch['mz'].shape
        out = dict(batch)
        out['mz'] = jnp.tile(batch['mz'][:, None], (1, n, 1)).reshape(-1, sl)
        out['ab'] = jnp.tile(batch['ab'][:, None], (1, n, 1)).reshape(-1, sl)
        for k in ('length', 'charge', 'mass', 'peplen'):
            out[k] = jnp.tile(batch[k][:, None], (1, n)).reshape(-1)
        return out

    # --- Seq2SeqDiff.predict_sequence ---
    def predict_sequence(self, batch, n=None):
        bs, _ = batch['mz'].shape
        n = self.ens_size if n is None else n

        # Deterministic stand-in decoder => all n ensemble members of a spectrum are identical,
        # so the fused kernel runs once per spectrum; no full_size tiling of seqs/logits in HBM.
        # TODO(synk): with a real stochastic diffusion decoder, the decoder stage must run per
        # ensemble member, and seqs/logits gathered via winners = arange(0, bs*n, n) + add_index.
        seqs_b, logits_p_b, mass_b = fused_forward(
            batch['mz'], batch['ab'], batch['length'], self.params)

        # Expand only tiny per-spectrum scalars for the pass/fail test.
        mass_e = jnp.repeat(batch['mass'], n)
        charge_e = jnp.repeat(batch['charge'], n)
        masses_sum = jnp.repeat(mass_b, n)
        passfail = jnp.abs(masses_sum - TOTAL_AA_MASS(mass_e, charge_e)) < self.mass_tol

        seqs_rs = jnp.broadcast_to(seqs_b[:, None, :], (bs, n, self.pep_len))
        pf_rs = passfail.reshape(bs, n)
        add_index = select_winners(seqs_rs, pf_rs)        # Pallas: counts + pass/fail argmax

        top_sequences = jnp.take_along_axis(
            seqs_rs, add_index[:, None, None], axis=1)[:, 0, :]
        top_logits = logits_p_b[:, :, :self.vocab]        # winner content == per-spectrum result
        return top_sequences, top_logits


# --------------------------------------------------------------------------
# Demo
# --------------------------------------------------------------------------

if __name__ == "__main__":
    bs, top_peaks, hidden, pep_len, vocab, ens_n = 2, 16, 32, 8, 24, 4

    key = jax.random.PRNGKey(0)
    kmz, kab, kchg, kmass, kparams = jax.random.split(key, 5)
    batch = {
        'mz': jax.random.uniform(kmz, (bs, top_peaks), jnp.float32, 100.0, 1500.0),
        'ab': jax.random.uniform(kab, (bs, top_peaks), jnp.float32, 0.0, 1.0),
        'charge': jax.random.randint(kchg, (bs,), 1, 4).astype(jnp.float32),
        'mass': jax.random.uniform(kmass, (bs,), jnp.float32, 300.0, 900.0),
        'length': jnp.full((bs,), top_peaks, jnp.int32),
        'peplen': jnp.full((bs,), pep_len, jnp.int32),
    }

    model = Seq2SeqDiffPallas(top_peaks=top_peaks, hidden=hidden, pep_len=pep_len,
                              vocab=vocab, ensemble_n=ens_n, mass_tol=0.5, key=kparams)

    # forward pass on the expanded batch (single fused Pallas kernel)
    seqs, logits = model.forward(model.expand_batch(batch))
    assert seqs.shape == (bs * ens_n, pep_len)
    assert logits.shape == (bs * ens_n, pep_len, vocab)

    # full ensemble predict_sequence path
    top_seqs, top_logits = model.predict_sequence(batch)
    jax.block_until_ready((seqs, logits, top_seqs, top_logits))
    assert top_seqs.shape == (bs, pep_len)
    assert top_logits.shape == (bs, pep_len, vocab)
    assert bool(jnp.all(top_seqs < vocab)) and bool(jnp.all(top_seqs >= 0))

    print("KERNEL_OK")
</pallas_src>

<mosaic_0001>
module attributes {stable_mosaic.version = 11 : i64} {
  func.func @_fused_forward_kernel(%arg0: i32, %arg1: memref<8x16xf32, #tpu.memory_space<vmem>>, %arg2: memref<8x16xf32, #tpu.memory_space<vmem>>, %arg3: memref<8x1xf32, #tpu.memory_space<vmem>>, %arg4: memref<2x128xf32, #tpu.memory_space<vmem>>, %arg5: memref<1x128xf32, #tpu.memory_space<vmem>>, %arg6: memref<128x128xf32, #tpu.memory_space<vmem>>, %arg7: memref<1x128xf32, #tpu.memory_space<vmem>>, %arg8: memref<128x128xf32, #tpu.memory_space<vmem>>, %arg9: memref<8x128xf32, #tpu.memory_space<vmem>>, %arg10: memref<1x128xf32, #tpu.memory_space<vmem>>, %arg11: memref<8x8xi32, #tpu.memory_space<vmem>>, %arg12: memref<8x8x128xbf16, #tpu.memory_space<vmem>>, %arg13: memref<8x1xf32, #tpu.memory_space<vmem>>) attributes {dimension_semantics = [#tpu.dimension_semantics<parallel>], iteration_bounds = array<i64: 1>, scalar_prefetch = 0 : i64, scratch_operands = 0 : i64, tpu.core_type = #tpu.core_type<tc>, window_params = [{transform_indices = @transform_0, window_bounds = array<i64: 8, 16>}, {transform_indices = @transform_1, window_bounds = array<i64: 8, 16>}, {transform_indices = @transform_2, window_bounds = array<i64: 8, 1>}, {pipeline_mode = #tpu.pipeline_mode<synchronous>, transform_indices = @transform_3, window_bounds = array<i64: 2, 128>}, {pipeline_mode = #tpu.pipeline_mode<synchronous>, transform_indices = @transform_4, window_bounds = array<i64: 1, 128>}, {pipeline_mode = #tpu.pipeline_mode<synchronous>, transform_indices = @transform_5, window_bounds = array<i64: 128, 128>}, {pipeline_mode = #tpu.pipeline_mode<synchronous>, transform_indices = @transform_6, window_bounds = array<i64: 1, 128>}, {pipeline_mode = #tpu.pipeline_mode<synchronous>, transform_indices = @transform_7, window_bounds = array<i64: 128, 128>}, {pipeline_mode = #tpu.pipeline_mode<synchronous>, transform_indices = @transform_8, window_bounds = array<i64: 8, 128>}, {pipeline_mode = #tpu.pipeline_mode<synchronous>, transform_indices = @transform_9, window_bounds = array<i64: 1, 128>}, {transform_indices = @transform_10, window_bounds = array<i64: 8, 8>}, {transform_indices = @transform_11, window_bounds = array<i64: 8, 8, 128>}, {transform_indices = @transform_12, window_bounds = array<i64: 8, 1>}]} {
    %c0 = arith.constant 0 : index
    %c0_0 = arith.constant 0 : index
    %0 = vector.load %arg1[%c0, %c0_0] : memref<8x16xf32, #tpu.memory_space<vmem>>, vector<8x16xf32>
    %c0_1 = arith.constant 0 : index
    %c0_2 = arith.constant 0 : index
    %1 = vector.load %arg2[%c0_1, %c0_2] : memref<8x16xf32, #tpu.memory_space<vmem>>, vector<8x16xf32>
    %c0_3 = arith.constant 0 : index
    %c0_4 = arith.constant 0 : index
    %2 = vector.load %arg3[%c0_3, %c0_4] : memref<8x1xf32, #tpu.memory_space<vmem>>, vector<8x1xf32>
    %c0_5 = arith.constant 0 : index
    %c0_6 = arith.constant 0 : index
    %3 = vector.load %arg4[%c0_5, %c0_6] : memref<2x128xf32, #tpu.memory_space<vmem>>, vector<1x128xf32>
    %c1 = arith.constant 1 : index
    %c0_7 = arith.constant 0 : index
    %4 = vector.load %arg4[%c1, %c0_7] : memref<2x128xf32, #tpu.memory_space<vmem>>, vector<1x128xf32>
    %c0_8 = arith.constant 0 : index
    %c0_9 = arith.constant 0 : index
    %5 = vector.load %arg5[%c0_8, %c0_9] : memref<1x128xf32, #tpu.memory_space<vmem>>, vector<1x128xf32>
    %cst = arith.constant 0.000000e+00 : f32
    %6 = vector.broadcast %cst : f32 to vector<8x128xf32>
    %cst_10 = arith.constant 0.000000e+00 : f32
    %7 = vector.broadcast %cst_10 : f32 to vector<8x1xf32>
    %8 = arith.cmpf ogt, %2, %7 : vector<8x1xf32>
    %9 = arith.extui %8 : vector<8x1xi1> to vector<8x1xi32>
    %10 = arith.sitofp %9 : vector<8x1xi32> to vector<8x1xf32>
    %11 = vector.extract_strided_slice %0 {offsets = [0, 0], sizes = [8, 1], strides = [1, 1]} : vector<8x16xf32> to vector<8x1xf32>
    %12 = vector.broadcast %11 : vector<8x1xf32> to vector<8x128xf32>
    %13 = vector.broadcast %3 : vector<1x128xf32> to vector<8x128xf32>
    %14 = arith.mulf %12, %13 : vector<8x128xf32>
    %15 = vector.extract_strided_slice %1 {offsets = [0, 0], sizes = [8, 1], strides = [1, 1]} : vector<8x16xf32> to vector<8x1xf32>
    %16 = vector.broadcast %15 : vector<8x1xf32> to vector<8x128xf32>
    %17 = vector.broadcast %4 : vector<1x128xf32> to vector<8x128xf32>
    %18 = arith.mulf %16, %17 : vector<8x128xf32>
    %19 = arith.addf %14, %18 : vector<8x128xf32>
    %20 = vector.broadcast %5 : vector<1x128xf32> to vector<8x128xf32>
    %21 = arith.addf %19, %20 : vector<8x128xf32>
    %cst_11 = arith.constant 0.000000e+00 : f32
    %22 = vector.broadcast %cst_11 : f32 to vector<8x128xf32>
    %23 = arith.maximumf %21, %22 : vector<8x128xf32>
    %24 = vector.broadcast %10 : vector<8x1xf32> to vector<8x128xf32>
    %25 = arith.mulf %24, %23 : vector<8x128xf32>
    %26 = arith.addf %6, %25 : vector<8x128xf32>
    %cst_12 = arith.constant 1.000000e+00 : f32
    %27 = vector.broadcast %cst_12 : f32 to vector<8x1xf32>
    %28 = arith.cmpf ogt, %2, %27 : vector<8x1xf32>
    %29 = arith.extui %28 : vector<8x1xi1> to vector<8x1xi32>
    %30 = arith.sitofp %29 : vector<8x1xi32> to vector<8x1xf32>
    %31 = vector.extract_strided_slice %0 {offsets = [0, 1], sizes = [8, 1], strides = [1, 1]} : vector<8x16xf32> to vector<8x1xf32>
    %32 = vector.broadcast %31 : vector<8x1xf32> to vector<8x128xf32>
    %33 = vector.broadcast %3 : vector<1x128xf32> to vector<8x128xf32>
    %34 = arith.mulf %32, %33 : vector<8x128xf32>
    %35 = vector.extract_strided_slice %1 {offsets = [0, 1], sizes = [8, 1], strides = [1, 1]} : vector<8x16xf32> to vector<8x1xf32>
    %36 = vector.broadcast %35 : vector<8x1xf32> to vector<8x128xf32>
    %37 = vector.broadcast %4 : vector<1x128xf32> to vector<8x128xf32>
    %38 = arith.mulf %36, %37 : vector<8x128xf32>
    %39 = arith.addf %34, %38 : vector<8x128xf32>
    %40 = vector.broadcast %5 : vector<1x128xf32> to vector<8x128xf32>
    %41 = arith.addf %39, %40 : vector<8x128xf32>
    %cst_13 = arith.constant 0.000000e+00 : f32
    %42 = vector.broadcast %cst_13 : f32 to vector<8x128xf32>
    %43 = arith.maximumf %41, %42 : vector<8x128xf32>
    %44 = vector.broadcast %30 : vector<8x1xf32> to vector<8x128xf32>
    %45 = arith.mulf %44, %43 : vector<8x128xf32>
    %46 = arith.addf %26, %45 : vector<8x128xf32>
    %cst_14 = arith.constant 2.000000e+00 : f32
    %47 = vector.broadcast %cst_14 : f32 to vector<8x1xf32>
    %48 = arith.cmpf ogt, %2, %47 : vector<8x1xf32>
    %49 = arith.extui %48 : vector<8x1xi1> to vector<8x1xi32>
    %50 = arith.sitofp %49 : vector<8x1xi32> to vector<8x1xf32>
    %51 = vector.extract_strided_slice %0 {offsets = [0, 2], sizes = [8, 1], strides = [1, 1]} : vector<8x16xf32> to vector<8x1xf32>
    %52 = vector.broadcast %51 : vector<8x1xf32> to vector<8x128xf32>
    %53 = vector.broadcast %3 : vector<1x128xf32> to vector<8x128xf32>
    %54 = arith.mulf %52, %53 : vector<8x128xf32>
    %55 = vector.extract_strided_slice %1 {offsets = [0, 2], sizes = [8, 1], strides = [1, 1]} : vector<8x16xf32> to vector<8x1xf32>
    %56 = vector.broadcast %55 : vector<8x1xf32> to vector<8x128xf32>
    %57 = vector.broadcast %4 : vector<1x128xf32> to vector<8x128xf32>
    %58 = arith.mulf %56, %57 : vector<8x128xf32>
    %59 = arith.addf %54, %58 : vector<8x128xf32>
    %60 = vector.broadcast %5 : vector<1x128xf32> to vector<8x128xf32>
    %61 = arith.addf %59, %60 : vector<8x128xf32>
    %cst_15 = arith.constant 0.000000e+00 : f32
    %62 = vector.broadcast %cst_15 : f32 to vector<8x128xf32>
    %63 = arith.maximumf %61, %62 : vector<8x128xf32>
    %64 = vector.broadcast %50 : vector<8x1xf32> to vector<8x128xf32>
    %65 = arith.mulf %64, %63 : vector<8x128xf32>
    %66 = arith.addf %46, %65 : vector<8x128xf32>
    %cst_16 = arith.constant 3.000000e+00 : f32
    %67 = vector.broadcast %cst_16 : f32 to vector<8x1xf32>
    %68 = arith.cmpf ogt, %2, %67 : vector<8x1xf32>
    %69 = arith.extui %68 : vector<8x1xi1> to vector<8x1xi32>
    %70 = arith.sitofp %69 : vector<8x1xi32> to vector<8x1xf32>
    %71 = vector.extract_strided_slice %0 {offsets = [0, 3], sizes = [8, 1], strides = [1, 1]} : vector<8x16xf32> to vector<8x1xf32>
    %72 = vector.broadcast %71 : vector<8x1xf32> to vector<8x128xf32>
    %73 = vector.broadcast %3 : vector<1x128xf32> to vector<8x128xf32>
    %74 = arith.mulf %72, %73 : vector<8x128xf32>
    %75 = vector.extract_strided_slice %1 {offsets = [0, 3], sizes = [8, 1], strides = [1, 1]} : vector<8x16xf32> to vector<8x1xf32>
    %76 = vector.broadcast %75 : vector<8x1xf32> to vector<8x128xf32>
    %77 = vector.broadcast %4 : vector<1x128xf32> to vector<8x128xf32>
    %78 = arith.mulf %76, %77 : vector<8x128xf32>
    %79 = arith.addf %74, %78 : vector<8x128xf32>
    %80 = vector.broadcast %5 : vector<1x128xf32> to vector<8x128xf32>
    %81 = arith.addf %79, %80 : vector<8x128xf32>
    %cst_17 = arith.constant 0.000000e+00 : f32
    %82 = vector.broadcast %cst_17 : f32 to vector<8x128xf32>
    %83 = arith.maximumf %81, %82 : vector<8x128xf32>
    %84 = vector.broadcast %70 : vector<8x1xf32> to vector<8x128xf32>
    %85 = arith.mulf %84, %83 : vector<8x128xf32>
    %86 = arith.addf %66, %85 : vector<8x128xf32>
    %cst_18 = arith.constant 4.000000e+00 : f32
    %87 = vector.broadcast %cst_18 : f32 to vector<8x1xf32>
    %88 = arith.cmpf ogt, %2, %87 : vector<8x1xf32>
    %89 = arith.extui %88 : vector<8x1xi1> to vector<8x1xi32>
    %90 = arith.sitofp %89 : vector<8x1xi32> to vector<8x1xf32>
    %91 = vector.extract_strided_slice %0 {offsets = [0, 4], sizes = [8, 1], strides = [1, 1]} : vector<8x16xf32> to vector<8x1xf32>
    %92 = vector.broadcast %91 : vector<8x1xf32> to vector<8x128xf32>
    %93 = vector.broadcast %3 : vector<1x128xf32> to vector<8x128xf32>
    %94 = arith.mulf %92, %93 : vector<8x128xf32>
    %95 = vector.extract_strided_slice %1 {offsets = [0, 4], sizes = [8, 1], strides = [1, 1]} : vector<8x16xf32> to vector<8x1xf32>
    %96 = vector.broadcast %95 : vector<8x1xf32> to vector<8x128xf32>
    %97 = vector.broadcast %4 : vector<1x128xf32> to vector<8x128xf32>
    %98 = arith.mulf %96, %97 : vector<8x128xf32>
    %99 = arith.addf %94, %98 : vector<8x128xf32>
    %100 = vector.broadcast %5 : vector<1x128xf32> to vector<8x128xf32>
    %101 = arith.addf %99, %100 : vector<8x128xf32>
    %cst_19 = arith.constant 0.000000e+00 : f32
    %102 = vector.broadcast %cst_19 : f32 to vector<8x128xf32>
    %103 = arith.maximumf %101, %102 : vector<8x128xf32>
    %104 = vector.broadcast %90 : vector<8x1xf32> to vector<8x128xf32>
    %105 = arith.mulf %104, %103 : vector<8x128xf32>
    %106 = arith.addf %86, %105 : vector<8x128xf32>
    %cst_20 = arith.constant 5.000000e+00 : f32
    %107 = vector.broadcast %cst_20 : f32 to vector<8x1xf32>
    %108 = arith.cmpf ogt, %2, %107 : vector<8x1xf32>
    %109 = arith.extui %108 : vector<8x1xi1> to vector<8x1xi32>
    %110 = arith.sitofp %109 : vector<8x1xi32> to vector<8x1xf32>
    %111 = vector.extract_strided_slice %0 {offsets = [0, 5], sizes = [8, 1], strides = [1, 1]} : vector<8x16xf32> to vector<8x1xf32>
    %112 = vector.broadcast %111 : vector<8x1xf32> to vector<8x128xf32>
    %113 = vector.broadcast %3 : vector<1x128xf32> to vector<8x128xf32>
    %114 = arith.mulf %112, %113 : vector<8x128xf32>
    %115 = vector.extract_strided_slice %1 {offsets = [0, 5], sizes = [8, 1], strides = [1, 1]} : vector<8x16xf32> to vector<8x1xf32>
    %116 = vector.broadcast %115 : vector<8x1xf32> to vector<8x128xf32>
    %117 = vector.broadcast %4 : vector<1x128xf32> to vector<8x128xf32>
    %118 = arith.mulf %116, %117 : vector<8x128xf32>
    %119 = arith.addf %114, %118 : vector<8x128xf32>
    %120 = vector.broadcast %5 : vector<1x128xf32> to vector<8x128xf32>
    %121 = arith.addf %119, %120 : vector<8x128xf32>
    %cst_21 = arith.constant 0.000000e+00 : f32
    %122 = vector.broadcast %cst_21 : f32 to vector<8x128xf32>
    %123 = arith.maximumf %121, %122 : vector<8x128xf32>
    %124 = vector.broadcast %110 : vector<8x1xf32> to vector<8x128xf32>
    %125 = arith.mulf %124, %123 : vector<8x128xf32>
    %126 = arith.addf %106, %125 : vector<8x128xf32>
    %cst_22 = arith.constant 6.000000e+00 : f32
    %127 = vector.broadcast %cst_22 : f32 to vector<8x1xf32>
    %128 = arith.cmpf ogt, %2, %127 : vector<8x1xf32>
    %129 = arith.extui %128 : vector<8x1xi1> to vector<8x1xi32>
    %130 = arith.sitofp %129 : vector<8x1xi32> to vector<8x1xf32>
    %131 = vector.extract_strided_slice %0 {offsets = [0, 6], sizes = [8, 1], strides = [1, 1]} : vector<8x16xf32> to vector<8x1xf32>
    %132 = vector.broadcast %131 : vector<8x1xf32> to vector<8x128xf32>
    %133 = vector.broadcast %3 : vector<1x128xf32> to vector<8x128xf32>
    %134 = arith.mulf %132, %133 : vector<8x128xf32>
    %135 = vector.extract_strided_slice %1 {offsets = [0, 6], sizes = [8, 1], strides = [1, 1]} : vector<8x16xf32> to vector<8x1xf32>
    %136 = vector.broadcast %135 : vector<8x1xf32> to vector<8x128xf32>
    %137 = vector.broadcast %4 : vector<1x128xf32> to vector<8x128xf32>
    %138 = arith.mulf %136, %137 : vector<8x128xf32>
    %139 = arith.addf %134, %138 : vector<8x128xf32>
    %140 = vector.broadcast %5 : vector<1x128xf32> to vector<8x128xf32>
    %141 = arith.addf %139, %140 : vector<8x128xf32>
    %cst_23 = arith.constant 0.000000e+00 : f32
    %142 = vector.broadcast %cst_23 : f32 to vector<8x128xf32>
    %143 = arith.maximumf %141, %142 : vector<8x128xf32>
    %144 = vector.broadcast %130 : vector<8x1xf32> to vector<8x128xf32>
    %145 = arith.mulf %144, %143 : vector<8x128xf32>
    %146 = arith.addf %126, %145 : vector<8x128xf32>
    %cst_24 = arith.constant 7.000000e+00 : f32
    %147 = vector.broadcast %cst_24 : f32 to vector<8x1xf32>
    %148 = arith.cmpf ogt, %2, %147 : vector<8x1xf32>
    %149 = arith.extui %148 : vector<8x1xi1> to vector<8x1xi32>
    %150 = arith.sitofp %149 : vector<8x1xi32> to vector<8x1xf32>
    %151 = vector.extract_strided_slice %0 {offsets = [0, 7], sizes = [8, 1], strides = [1, 1]} : vector<8x16xf32> to vector<8x1xf32>
    %152 = vector.broadcast %151 : vector<8x1xf32> to vector<8x128xf32>
    %153 = vector.broadcast %3 : vector<1x128xf32> to vector<8x128xf32>
    %154 = arith.mulf %152, %153 : vector<8x128xf32>
    %155 = vector.extract_strided_slice %1 {offsets = [0, 7], sizes = [8, 1], strides = [1, 1]} : vector<8x16xf32> to vector<8x1xf32>
    %156 = vector.broadcast %155 : vector<8x1xf32> to vector<8x128xf32>
    %157 = vector.broadcast %4 : vector<1x128xf32> to vector<8x128xf32>
    %158 = arith.mulf %156, %157 : vector<8x128xf32>
    %159 = arith.addf %154, %158 : vector<8x128xf32>
    %160 = vector.broadcast %5 : vector<1x128xf32> to vector<8x128xf32>
    %161 = arith.addf %159, %160 : vector<8x128xf32>
    %cst_25 = arith.constant 0.000000e+00 : f32
    %162 = vector.broadcast %cst_25 : f32 to vector<8x128xf32>
    %163 = arith.maximumf %161, %162 : vector<8x128xf32>
    %164 = vector.broadcast %150 : vector<8x1xf32> to vector<8x128xf32>
    %165 = arith.mulf %164, %163 : vector<8x128xf32>
    %166 = arith.addf %146, %165 : vector<8x128xf32>
    %cst_26 = arith.constant 8.000000e+00 : f32
    %167 = vector.broadcast %cst_26 : f32 to vector<8x1xf32>
    %168 = arith.cmpf ogt, %2, %167 : vector<8x1xf32>
    %169 = arith.extui %168 : vector<8x1xi1> to vector<8x1xi32>
    %170 = arith.sitofp %169 : vector<8x1xi32> to vector<8x1xf32>
    %171 = vector.extract_strided_slice %0 {offsets = [0, 8], sizes = [8, 1], strides = [1, 1]} : vector<8x16xf32> to vector<8x1xf32>
    %172 = vector.broadcast %171 : vector<8x1xf32> to vector<8x128xf32>
    %173 = vector.broadcast %3 : vector<1x128xf32> to vector<8x128xf32>
    %174 = arith.mulf %172, %173 : vector<8x128xf32>
    %175 = vector.extract_strided_slice %1 {offsets = [0, 8], sizes = [8, 1], strides = [1, 1]} : vector<8x16xf32> to vector<8x1xf32>
    %176 = vector.broadcast %175 : vector<8x1xf32> to vector<8x128xf32>
    %177 = vector.broadcast %4 : vector<1x128xf32> to vector<8x128xf32>
    %178 = arith.mulf %176, %177 : vector<8x128xf32>
    %179 = arith.addf %174, %178 : vector<8x128xf32>
    %180 = vector.broadcast %5 : vector<1x128xf32> to vector<8x128xf32>
    %181 = arith.addf %179, %180 : vector<8x128xf32>
    %cst_27 = arith.constant 0.000000e+00 : f32
    %182 = vector.broadcast %cst_27 : f32 to vector<8x128xf32>
    %183 = arith.maximumf %181, %182 : vector<8x128xf32>
    %184 = vector.broadcast %170 : vector<8x1xf32> to vector<8x128xf32>
    %185 = arith.mulf %184, %183 : vector<8x128xf32>
    %186 = arith.addf %166, %185 : vector<8x128xf32>
    %cst_28 = arith.constant 9.000000e+00 : f32
    %187 = vector.broadcast %cst_28 : f32 to vector<8x1xf32>
    %188 = arith.cmpf ogt, %2, %187 : vector<8x1xf32>
    %189 = arith.extui %188 : vector<8x1xi1> to vector<8x1xi32>
    %190 = arith.sitofp %189 : vector<8x1xi32> to vector<8x1xf32>
    %191 = vector.extract_strided_slice %0 {offsets = [0, 9], sizes = [8, 1], strides = [1, 1]} : vector<8x16xf32> to vector<8x1xf32>
    %192 = vector.broadcast %191 : vector<8x1xf32> to vector<8x128xf32>
    %193 = vector.broadcast %3 : vector<1x128xf32> to vector<8x128xf32>
    %194 = arith.mulf %192, %193 : vector<8x128xf32>
    %195 = vector.extract_strided_slice %1 {offsets = [0, 9], sizes = [8, 1], strides = [1, 1]} : vector<8x16xf32> to vector<8x1xf32>
    %196 = vector.broadcast %195 : vector<8x1xf32> to vector<8x128xf32>
    %197 = vector.broadcast %4 : vector<1x128xf32> to vector<8x128xf32>
    %198 = arith.mulf %196, %197 : vector<8x128xf32>
    %199 = arith.addf %194, %198 : vector<8x128xf32>
    %200 = vector.broadcast %5 : vector<1x128xf32> to vector<8x128xf32>
    %201 = arith.addf %199, %200 : vector<8x128xf32>
    %cst_29 = arith.constant 0.000000e+00 : f32
    %202 = vector.broadcast %cst_29 : f32 to vector<8x128xf32>
    %203 = arith.maximumf %201, %202 : vector<8x128xf32>
    %204 = vector.broadcast %190 : vector<8x1xf32> to vector<8x128xf32>
    %205 = arith.mulf %204, %203 : vector<8x128xf32>
    %206 = arith.addf %186, %205 : vector<8x128xf32>
    %cst_30 = arith.constant 1.000000e+01 : f32
    %207 = vector.broadcast %cst_30 : f32 to vector<8x1xf32>
    %208 = arith.cmpf ogt, %2, %207 : vector<8x1xf32>
    %209 = arith.extui %208 : vector<8x1xi1> to vector<8x1xi32>
    %210 = arith.sitofp %209 : vector<8x1xi32> to vector<8x1xf32>
    %211 = vector.extract_strided_slice %0 {offsets = [0, 10], sizes = [8, 1], strides = [1, 1]} : vector<8x16xf32> to vector<8x1xf32>
    %212 = vector.broadcast %211 : vector<8x1xf32> to vector<8x128xf32>
    %213 = vector.broadcast %3 : vector<1x128xf32> to vector<8x128xf32>
    %214 = arith.mulf %212, %213 : vector<8x128xf32>
    %215 = vector.extract_strided_slice %1 {offsets = [0, 10], sizes = [8, 1], strides = [1, 1]} : vector<8x16xf32> to vector<8x1xf32>
    %216 = vector.broadcast %215 : vector<8x1xf32> to vector<8x128xf32>
    %217 = vector.broadcast %4 : vector<1x128xf32> to vector<8x128xf32>
    %218 = arith.mulf %216, %217 : vector<8x128xf32>
    %219 = arith.addf %214, %218 : vector<8x128xf32>
    %220 = vector.broadcast %5 : vector<1x128xf32> to vector<8x128xf32>
    %221 = arith.addf %219, %220 : vector<8x128xf32>
    %cst_31 = arith.constant 0.000000e+00 : f32
    %222 = vector.broadcast %cst_31 : f32 to vector<8x128xf32>
    %223 = arith.maximumf %221, %222 : vector<8x128xf32>
    %224 = vector.broadcast %210 : vector<8x1xf32> to vector<8x128xf32>
    %225 = arith.mulf %224, %223 : vector<8x128xf32>
    %226 = arith.addf %206, %225 : vector<8x128xf32>
    %cst_32 = arith.constant 1.100000e+01 : f32
    %227 = vector.broadcast %cst_32 : f32 to vector<8x1xf32>
    %228 = arith.cmpf ogt, %2, %227 : vector<8x1xf32>
    %229 = arith.extui %228 : vector<8x1xi1> to vector<8x1xi32>
    %230 = arith.sitofp %229 : vector<8x1xi32> to vector<8x1xf32>
    %231 = vector.extract_strided_slice %0 {offsets = [0, 11], sizes = [8, 1], strides = [1, 1]} : vector<8x16xf32> to vector<8x1xf32>
    %232 = vector.broadcast %231 : vector<8x1xf32> to vector<8x128xf32>
    %233 = vector.broadcast %3 : vector<1x128xf32> to vector<8x128xf32>
    %234 = arith.mulf %232, %233 : vector<8x128xf32>
    %235 = vector.extract_strided_slice %1 {offsets = [0, 11], sizes = [8, 1], strides = [1, 1]} : vector<8x16xf32> to vector<8x1xf32>
    %236 = vector.broadcast %235 : vector<8x1xf32> to vector<8x128xf32>
    %237 = vector.broadcast %4 : vector<1x128xf32> to vector<8x128xf32>
    %238 = arith.mulf %236, %237 : vector<8x128xf32>
    %239 = arith.addf %234, %238 : vector<8x128xf32>
    %240 = vector.broadcast %5 : vector<1x128xf32> to vector<8x128xf32>
    %241 = arith.addf %239, %240 : vector<8x128xf32>
    %cst_33 = arith.constant 0.000000e+00 : f32
    %242 = vector.broadcast %cst_33 : f32 to vector<8x128xf32>
    %243 = arith.maximumf %241, %242 : vector<8x128xf32>
    %244 = vector.broadcast %230 : vector<8x1xf32> to vector<8x128xf32>
    %245 = arith.mulf %244, %243 : vector<8x128xf32>
    %246 = arith.addf %226, %245 : vector<8x128xf32>
    %cst_34 = arith.constant 1.200000e+01 : f32
    %247 = vector.broadcast %cst_34 : f32 to vector<8x1xf32>
    %248 = arith.cmpf ogt, %2, %247 : vector<8x1xf32>
    %249 = arith.extui %248 : vector<8x1xi1> to vector<8x1xi32>
    %250 = arith.sitofp %249 : vector<8x1xi32> to vector<8x1xf32>
    %251 = vector.extract_strided_slice %0 {offsets = [0, 12], sizes = [8, 1], strides = [1, 1]} : vector<8x16xf32> to vector<8x1xf32>
    %252 = vector.broadcast %251 : vector<8x1xf32> to vector<8x128xf32>
    %253 = vector.broadcast %3 : vector<1x128xf32> to vector<8x128xf32>
    %254 = arith.mulf %252, %253 : vector<8x128xf32>
    %255 = vector.extract_strided_slice %1 {offsets = [0, 12], sizes = [8, 1], strides = [1, 1]} : vector<8x16xf32> to vector<8x1xf32>
    %256 = vector.broadcast %255 : vector<8x1xf32> to vector<8x128xf32>
    %257 = vector.broadcast %4 : vector<1x128xf32> to vector<8x128xf32>
    %258 = arith.mulf %256, %257 : vector<8x128xf32>
    %259 = arith.addf %254, %258 : vector<8x128xf32>
    %260 = vector.broadcast %5 : vector<1x128xf32> to vector<8x128xf32>
    %261 = arith.addf %259, %260 : vector<8x128xf32>
    %cst_35 = arith.constant 0.000000e+00 : f32
    %262 = vector.broadcast %cst_35 : f32 to vector<8x128xf32>
    %263 = arith.maximumf %261, %262 : vector<8x128xf32>
    %264 = vector.broadcast %250 : vector<8x1xf32> to vector<8x128xf32>
    %265 = arith.mulf %264, %263 : vector<8x128xf32>
    %266 = arith.addf %246, %265 : vector<8x128xf32>
    %cst_36 = arith.constant 1.300000e+01 : f32
    %267 = vector.broadcast %cst_36 : f32 to vector<8x1xf32>
    %268 = arith.cmpf ogt, %2, %267 : vector<8x1xf32>
    %269 = arith.extui %268 : vector<8x1xi1> to vector<8x1xi32>
    %270 = arith.sitofp %269 : vector<8x1xi32> to vector<8x1xf32>
    %271 = vector.extract_strided_slice %0 {offsets = [0, 13], sizes = [8, 1], strides = [1, 1]} : vector<8x16xf32> to vector<8x1xf32>
    %272 = vector.broadcast %271 : vector<8x1xf32> to vector<8x128xf32>
    %273 = vector.broadcast %3 : vector<1x128xf32> to vector<8x128xf32>
    %274 = arith.mulf %272, %273 : vector<8x128xf32>
    %275 = vector.extract_strided_slice %1 {offsets = [0, 13], sizes = [8, 1], strides = [1, 1]} : vector<8x16xf32> to vector<8x1xf32>
    %276 = vector.broadcast %275 : vector<8x1xf32> to vector<8x128xf32>
    %277 = vector.broadcast %4 : vector<1x128xf32> to vector<8x128xf32>
    %278 = arith.mulf %276, %277 : vector<8x128xf32>
    %279 = arith.addf %274, %278 : vector<8x128xf32>
    %280 = vector.broadcast %5 : vector<1x128xf32> to vector<8x128xf32>
    %281 = arith.addf %279, %280 : vector<8x128xf32>
    %cst_37 = arith.constant 0.000000e+00 : f32
    %282 = vector.broadcast %cst_37 : f32 to vector<8x128xf32>
    %283 = arith.maximumf %281, %282 : vector<8x128xf32>
    %284 = vector.broadcast %270 : vector<8x1xf32> to vector<8x128xf32>
    %285 = arith.mulf %284, %283 : vector<8x128xf32>
    %286 = arith.addf %266, %285 : vector<8x128xf32>
    %cst_38 = arith.constant 1.400000e+01 : f32
    %287 = vector.broadcast %cst_38 : f32 to vector<8x1xf32>
    %288 = arith.cmpf ogt, %2, %287 : vector<8x1xf32>
    %289 = arith.extui %288 : vector<8x1xi1> to vector<8x1xi32>
    %290 = arith.sitofp %289 : vector<8x1xi32> to vector<8x1xf32>
    %291 = vector.extract_strided_slice %0 {offsets = [0, 14], sizes = [8, 1], strides = [1, 1]} : vector<8x16xf32> to vector<8x1xf32>
    %292 = vector.broadcast %291 : vector<8x1xf32> to vector<8x128xf32>
    %293 = vector.broadcast %3 : vector<1x128xf32> to vector<8x128xf32>
    %294 = arith.mulf %292, %293 : vector<8x128xf32>
    %295 = vector.extract_strided_slice %1 {offsets = [0, 14], sizes = [8, 1], strides = [1, 1]} : vector<8x16xf32> to vector<8x1xf32>
    %296 = vector.broadcast %295 : vector<8x1xf32> to vector<8x128xf32>
    %297 = vector.broadcast %4 : vector<1x128xf32> to vector<8x128xf32>
    %298 = arith.mulf %296, %297 : vector<8x128xf32>
    %299 = arith.addf %294, %298 : vector<8x128xf32>
    %300 = vector.broadcast %5 : vector<1x128xf32> to vector<8x128xf32>
    %301 = arith.addf %299, %300 : vector<8x128xf32>
    %cst_39 = arith.constant 0.000000e+00 : f32
    %302 = vector.broadcast %cst_39 : f32 to vector<8x128xf32>
    %303 = arith.maximumf %301, %302 : vector<8x128xf32>
    %304 = vector.broadcast %290 : vector<8x1xf32> to vector<8x128xf32>
    %305 = arith.mulf %304, %303 : vector<8x128xf32>
    %306 = arith.addf %286, %305 : vector<8x128xf32>
    %cst_40 = arith.constant 1.500000e+01 : f32
    %307 = vector.broadcast %cst_40 : f32 to vector<8x1xf32>
    %308 = arith.cmpf ogt, %2, %307 : vector<8x1xf32>
    %309 = arith.extui %308 : vector<8x1xi1> to vector<8x1xi32>
    %310 = arith.sitofp %309 : vector<8x1xi32> to vector<8x1xf32>
    %311 = vector.extract_strided_slice %0 {offsets = [0, 15], sizes = [8, 1], strides = [1, 1]} : vector<8x16xf32> to vector<8x1xf32>
    %312 = vector.broadcast %311 : vector<8x1xf32> to vector<8x128xf32>
    %313 = vector.broadcast %3 : vector<1x128xf32> to vector<8x128xf32>
    %314 = arith.mulf %312, %313 : vector<8x128xf32>
    %315 = vector.extract_strided_slice %1 {offsets = [0, 15], sizes = [8, 1], strides = [1, 1]} : vector<8x16xf32> to vector<8x1xf32>
    %316 = vector.broadcast %315 : vector<8x1xf32> to vector<8x128xf32>
    %317 = vector.broadcast %4 : vector<1x128xf32> to vector<8x128xf32>
    %318 = arith.mulf %316, %317 : vector<8x128xf32>
    %319 = arith.addf %314, %318 : vector<8x128xf32>
    %320 = vector.broadcast %5 : vector<1x128xf32> to vector<8x128xf32>
    %321 = arith.addf %319, %320 : vector<8x128xf32>
    %cst_41 = arith.constant 0.000000e+00 : f32
    %322 = vector.broadcast %cst_41 : f32 to vector<8x128xf32>
    %323 = arith.maximumf %321, %322 : vector<8x128xf32>
    %324 = vector.broadcast %310 : vector<8x1xf32> to vector<8x128xf32>
    %325 = arith.mulf %324, %323 : vector<8x128xf32>
    %326 = arith.addf %306, %325 : vector<8x128xf32>
    %cst_42 = arith.constant 1.000000e+00 : f32
    %327 = vector.broadcast %cst_42 : f32 to vector<8x1xf32>
    %328 = arith.maximumf %2, %327 : vector<8x1xf32>
    %cst_43 = arith.constant 1.000000e+00 : f32
    %329 = vector.broadcast %cst_43 : f32 to vector<8x1xf32>
    %330 = arith.divf %329, %328 : vector<8x1xf32>
    %331 = vector.broadcast %330 : vector<8x1xf32> to vector<8x128xf32>
    %332 = arith.mulf %326, %331 : vector<8x128xf32>
    %c0_44 = arith.constant 0 : index
    %c0_45 = arith.constant 0 : index
    %333 = vector.load %arg6[%c0_44, %c0_45] : memref<128x128xf32, #tpu.memory_space<vmem>>, vector<128x128xf32>
    %cst_46 = arith.constant dense<0.000000e+00> : vector<8x128xf32>
    %334 = tpu.matmul %332, %333, %cst_46 {dimension_numbers = #tpu.dot_dimension_numbers<[1], [0], [0], [1], [0, 0, 1, 1], [], []>} : vector<8x128xf32>, vector<128x128xf32>, vector<8x128xf32> -> vector<8x128xf32>
    %c0_47 = arith.constant 0 : index
    %c0_48 = arith.constant 0 : index
    %335 = vector.load %arg7[%c0_47, %c0_48] : memref<1x128xf32, #tpu.memory_space<vmem>>, vector<1x128xf32>
    %336 = vector.broadcast %335 : vector<1x128xf32> to vector<8x128xf32>
    %337 = arith.addf %334, %336 : vector<8x128xf32>
    %c0_49 = arith.constant 0 : index
    %c0_50 = arith.constant 0 : index
    %338 = vector.load %arg8[%c0_49, %c0_50] : memref<128x128xf32, #tpu.memory_space<vmem>>, vector<128x128xf32>
    %cst_51 = arith.constant dense<0.000000e+00> : vector<8x128xf32>
    %339 = tpu.matmul %337, %338, %cst_51 {dimension_numbers = #tpu.dot_dimension_numbers<[1], [0], [0], [1], [0, 0, 1, 1], [], []>} : vector<8x128xf32>, vector<128x128xf32>, vector<8x128xf32> -> vector<8x128xf32>
    %340 = vector.shape_cast %339 : vector<8x128xf32> to vector<8x1x128xf32>
    %c0_52 = arith.constant 0 : index
    %c0_53 = arith.constant 0 : index
    %341 = vector.load %arg9[%c0_52, %c0_53] : memref<8x128xf32, #tpu.memory_space<vmem>>, vector<8x128xf32>
    %342 = vector.shape_cast %341 : vector<8x128xf32> to vector<1x8x128xf32>
    %343 = vector.broadcast %340 : vector<8x1x128xf32> to vector<8x8x128xf32>
    %344 = vector.broadcast %342 : vector<1x8x128xf32> to vector<8x8x128xf32>
    %345 = arith.addf %343, %344 : vector<8x8x128xf32>
    %346 = arith.truncf %345 : vector<8x8x128xf32> to vector<8x8x128xbf16>
    %c0_54 = arith.constant 0 : index
    %c0_55 = arith.constant 0 : index
    %c0_56 = arith.constant 0 : index
    %347 = vector.load %arg12[%c0_54, %c0_55, %c0_56] : memref<8x8x128xbf16, #tpu.memory_space<vmem>>, vector<8x8x128xbf16>
    tpu.vector_store %arg12[%c0_54, %c0_55, %c0_56], %346 {strides = array<i32>} : memref<8x8x128xbf16, #tpu.memory_space<vmem>>, vector<8x8x128xbf16>,
    %348 = tpu.iota {dimensions = array<i32: 2>} : vector<1x1x128xi32>
    %cst_57 = arith.constant dense<0xFF800000> : vector<8x8xf32>
    %349 = vector.multi_reduction <maximumf>, %345, %cst_57 [2] : vector<8x8x128xf32> to vector<8x8xf32>
    %350 = vector.shape_cast %349 : vector<8x8xf32> to vector<8x8x1xf32>
    %351 = vector.broadcast %350 : vector<8x8x1xf32> to vector<8x8x128xf32>
    %352 = arith.cmpf oeq, %345, %351 : vector<8x8x128xf32>
    %c128_i32 = arith.constant 128 : i32
    %353 = vector.shape_cast %348 : vector<1x1x128xi32> to vector<1x1x128xi32>
    %354 = vector.broadcast %353 : vector<1x1x128xi32> to vector<8x8x128xi32>
    %355 = vector.broadcast %c128_i32 : i32 to vector<8x8x128xi32>
    %356 = arith.select %352, %354, %355 : vector<8x8x128xi1>, vector<8x8x128xi32>
    %cst_58 = arith.constant dense<2147483647> : vector<8x8xi32>
    %357 = vector.multi_reduction <minsi>, %356, %cst_58 [2] : vector<8x8x128xi32> to vector<8x8xi32>
    %c0_59 = arith.constant 0 : index
    %c0_60 = arith.constant 0 : index
    %358 = vector.load %arg11[%c0_59, %c0_60] : memref<8x8xi32, #tpu.memory_space<vmem>>, vector<8x8xi32>
    tpu.vector_store %arg11[%c0_59, %c0_60], %357 {strides = array<i32>} : memref<8x8xi32, #tpu.memory_space<vmem>>, vector<8x8xi32>,
    %c0_61 = arith.constant 0 : index
    %c0_62 = arith.constant 0 : index
    %359 = vector.load %arg10[%c0_61, %c0_62] : memref<1x128xf32, #tpu.memory_space<vmem>>, vector<1x128xf32>
    %360 = vector.shape_cast %359 : vector<1x128xf32> to vector<1x1x128xf32>
    %361 = vector.shape_cast %357 : vector<8x8xi32> to vector<8x8x1xi32>
    %362 = vector.broadcast %348 : vector<1x1x128xi32> to vector<8x8x128xi32>
    %363 = vector.broadcast %361 : vector<8x8x1xi32> to vector<8x8x128xi32>
    %364 = arith.cmpi eq, %362, %363 : vector<8x8x128xi32>
    %cst_63 = arith.constant 0.000000e+00 : f32
    %365 = vector.shape_cast %360 : vector<1x1x128xf32> to vector<1x1x128xf32>
    %366 = vector.broadcast %365 : vector<1x1x128xf32> to vector<8x8x128xf32>
    %367 = vector.broadcast %cst_63 : f32 to vector<8x8x128xf32>
    %368 = arith.select %364, %366, %367 : vector<8x8x128xi1>, vector<8x8x128xf32>
    %cst_64 = arith.constant dense<0.000000e+00> : vector<8x8xf32>
    %369 = vector.multi_reduction <add>, %368, %cst_64 [2] : vector<8x8x128xf32> to vector<8x8xf32>
    %cst_65 = arith.constant dense<0.000000e+00> : vector<8xf32>
    %370 = vector.multi_reduction <add>, %369, %cst_65 [1] : vector<8x8xf32> to vector<8xf32>
    %371 = vector.shape_cast %370 : vector<8xf32> to vector<8x1xf32>
    %c0_66 = arith.constant 0 : index
    %c0_67 = arith.constant 0 : index
    %372 = vector.load %arg13[%c0_66, %c0_67] : memref<8x1xf32, #tpu.memory_space<vmem>>, vector<8x1xf32>
    tpu.vector_store %arg13[%c0_66, %c0_67], %371 {strides = array<i32>} : memref<8x1xf32, #tpu.memory_space<vmem>>, vector<8x1xf32>,
    return
  }
  func.func @transform_0(%arg0: i32) -> (i32, i32) {
    %c0_i32 = arith.constant 0 : i32
    %c0_i32_0 = arith.constant 0 : i32
    return %arg0, %c0_i32 : i32, i32
  }
  func.func @transform_1(%arg0: i32) -> (i32, i32) {
    %c0_i32 = arith.constant 0 : i32
    %c0_i32_0 = arith.constant 0 : i32
    return %arg0, %c0_i32 : i32, i32
  }
  func.func @transform_2(%arg0: i32) -> (i32, i32) {
    %c0_i32 = arith.constant 0 : i32
    %c0_i32_0 = arith.constant 0 : i32
    return %arg0, %c0_i32 : i32, i32
  }
  func.func @transform_3(%arg0: i32) -> (i32, i32) {
    %c0_i32 = arith.constant 0 : i32
    %c0_i32_0 = arith.constant 0 : i32
    %c0_i32_1 = arith.constant 0 : i32
    return %c0_i32, %c0_i32_0 : i32, i32
  }
  func.func @transform_4(%arg0: i32) -> (i32, i32) {
    %c0_i32 = arith.constant 0 : i32
    %c0_i32_0 = arith.constant 0 : i32
    %c0_i32_1 = arith.constant 0 : i32
    return %c0_i32, %c0_i32_0 : i32, i32
  }
  func.func @transform_5(%arg0: i32) -> (i32, i32) {
    %c0_i32 = arith.constant 0 : i32
    %c0_i32_0 = arith.constant 0 : i32
    %c0_i32_1 = arith.constant 0 : i32
    return %c0_i32, %c0_i32_0 : i32, i32
  }
  func.func @transform_6(%arg0: i32) -> (i32, i32) {
    %c0_i32 = arith.constant 0 : i32
    %c0_i32_0 = arith.constant 0 : i32
    %c0_i32_1 = arith.constant 0 : i32
    return %c0_i32, %c0_i32_0 : i32, i32
  }
  func.func @transform_7(%arg0: i32) -> (i32, i32) {
    %c0_i32 = arith.constant 0 : i32
    %c0_i32_0 = arith.constant 0 : i32
    %c0_i32_1 = arith.constant 0 : i32
    return %c0_i32, %c0_i32_0 : i32, i32
  }
  func.func @transform_8(%arg0: i32) -> (i32, i32) {
    %c0_i32 = arith.constant 0 : i32
    %c0_i32_0 = arith.constant 0 : i32
    %c0_i32_1 = arith.constant 0 : i32
    return %c0_i32, %c0_i32_0 : i32, i32
  }
  func.func @transform_9(%arg0: i32) -> (i32, i32) {
    %c0_i32 = arith.constant 0 : i32
    %c0_i32_0 = arith.constant 0 : i32
    %c0_i32_1 = arith.constant 0 : i32
    return %c0_i32, %c0_i32_0 : i32, i32
  }
  func.func @transform_10(%arg0: i32) -> (i32, i32) {
    %c0_i32 = arith.constant 0 : i32
    %c0_i32_0 = arith.constant 0 : i32
    return %arg0, %c0_i32 : i32, i32
  }
  func.func @transform_11(%arg0: i32) -> (i32, i32, i32) {
    %c0_i32 = arith.constant 0 : i32
    %c0_i32_0 = arith.constant 0 : i32
    %c0_i32_1 = arith.constant 0 : i32
    return %arg0, %c0_i32, %c0_i32_0 : i32, i32, i32
  }
  func.func @transform_12(%arg0: i32) -> (i32, i32) {
    %c0_i32 = arith.constant 0 : i32
    %c0_i32_0 = arith.constant 0 : i32
    return %arg0, %c0_i32 : i32, i32
  }
}

</mosaic_0001>

<bundles_post_ra>
// kernel: tpu_custom_call.1
= control target key start
LH: loop header
LB: loop body
LE: loop exit
PB: predicated region body
PF: predicated region fallthrough
CT: control target
= control target key end

     0   :  { %18 = vsyncpa [#allocation3], 0  ;;  %s1619_s0 = inlined_call_operand.vmem [shape: f32[8,16], index: 0, kind: input, shape index: {}]   ;;  %s1620_s1 = inlined_call_operand.hbm [shape: f32[8,16], index: 1, kind: input, shape index: {}]   ;;  %s1621_s2 = inlined_call_operand.vmem [shape: f32[8,1], index: 2, kind: input, shape index: {}]   ;;  %s1622_s3 = inlined_call_operand.hbm [shape: f32[2,128], index: 3, kind: input, shape index: {}]   ;;  %s1623_s4 = inlined_call_operand.vmem [shape: f32[1,128], index: 4, kind: input, shape index: {}]   ;;  %s1624_s5 = inlined_call_operand.hbm [shape: f32[128,128], index: 5, kind: input, shape index: {}]   ;;  %s1625_s6 = inlined_call_operand.vmem [shape: f32[1,128], index: 6, kind: input, shape index: {}]   ;;  %s1626_s7 = inlined_call_operand.hbm [shape: f32[128,128], index: 7, kind: input, shape index: {}]   ;;  %s1627_s8 = inlined_call_operand.hbm [shape: f32[8,128], index: 8, kind: input, shape index: {}]   ;;  %s1628_s9 = inlined_call_operand.vmem [shape: f32[1,128], index: 9, kind: input, shape index: {}]   ;;  %s1629_s10 = inlined_call_operand.hbm [shape: s32[8,8], index: 10, kind: output, shape index: {0}]   ;;  %s1630_s11 = inlined_call_operand.hbm [shape: bf16[8,8,128], index: 11, kind: output, shape index: {1}]   ;;  %s1631_s12 = inlined_call_operand.vmem [shape: f32[8,1], index: 12, kind: output, shape index: {2}]  }
   0x1   :  { %19 = vsyncpa [#allocation6], 0 }
   0x2   :  { %20 = vsyncpa [#allocation9], 0 }
   0x3   :  { %21 = vsyncpa [#allocation4], 0  ;;  %s43_s23 = sshll.u32 %s1622_s3, 4  ;;  %s44_s23 = int_to_ptr.hbm [resolvable:$true] %s43_s23 }
   0x4   :  { %22 = vsyncpa [#allocation13], 0  ;;  %s1245_s24 = smov [#allocation5]   ;;  %s70_s28 = sshll.u32 %s1626_s7, 4  ;;  %s71_s28 = int_to_ptr.hbm [resolvable:$true] %s70_s28 }
   0x5   :  { %s45_s25 = sshll.u32 %s1245_s24, 4  ;;  %s1246_s29 = smov [#allocation8]   ;;  %s46_s25 = int_to_ptr.vmem [resolvable:$true] %s45_s25 }
   0x6   :  { %48 = dma.hbm_to_vmem [thread:$0]  %s44_s23, 32, %s46_s25, [#allocation6]  }
   0x7   :  { %s72_s30 = sshll.u32 %s1246_s29, 4  ;;  %s30_s15 = sshll.u32 %s1620_s1, 4  ;;  %s73_s30 = int_to_ptr.vmem [resolvable:$true] %s72_s30  ;;  %s31_s15 = int_to_ptr.hbm [resolvable:$true] %s30_s15 }
   0x8   :  { %s1247_s3 = smov 128   ;;  %s1248_s16 = smov 8  }
   0x9   :  { %78 = dma.hbm_to_vmem [thread:$0]  %s71_s28, 2048, %s73_s30, [#allocation9], %s1247_s3, %s1247_s3, %s1248_s16  }
   0xa   :  { %s55_s19 = sshll.u32 %s1624_s5, 4  ;;  %s1249_s20 = smov [#allocation2]   ;;  %s56_s19 = int_to_ptr.hbm [resolvable:$true] %s55_s19 }
   0xb   :  { %s32_s21 = sshll.u32 %s1249_s20, 4  ;;  %s1250_s7 = smov [#allocation7]   ;;  %s33_s21 = int_to_ptr.vmem [resolvable:$true] %s32_s21 }
   0xc   :  { %35 = dma.hbm_to_vmem [thread:$0]  %s31_s15, 128, %s33_s21, [#allocation3]  }
   0xd   :  { %s57_s22 = sshll.u32 %s1250_s7, 4  ;;  %s84_s1 = sshll.u32 %s1627_s8, 4  ;;  %s58_s22 = int_to_ptr.vmem [resolvable:$true] %s57_s22  ;;  %s85_s1 = int_to_ptr.hbm [resolvable:$true] %s84_s1 }
   0xe   :  { %63 = dma.hbm_to_vmem [thread:$0]  %s56_s19, 2048, %s58_s22, [#allocation6], %s1247_s3, %s1247_s3, %s1248_s16  }
   0xf   :  { %s1251_s25 = smov [#allocation10]  }
  0x10   :  { %s86_s26 = sshll.u32 %s1251_s25, 4  ;;  %s87_s26 = int_to_ptr.vmem [resolvable:$true] %s86_s26 }
  0x11   :  { %89 = dma.hbm_to_vmem [thread:$0]  %s85_s1, 128, %s87_s26, [#allocation9]  }
  0x12   :  { %1235 = dma.done.wait [#allocation3], 128  }
  0x13   :  { %1236 = vsyncadd [#allocation3], 4294967168 }
  0x14   :  { %1237 = dma.done.wait [#allocation6], 2080  }
  0x15   :  { %1238 = vsyncadd [#allocation6], 4294965216 }
  0x16   :  { %1239 = dma.done.wait [#allocation9], 2176  }
  0x17   :  { %1240 = vsyncadd [#allocation9], 4294965120  ;;  %v1252_v0 = vmov 1   ;;  %v1253_v1 = vmov 0   ;;  %v1254_v2 = vmov 2   ;;  %v1357_v3 = vld [vmem:[%s1619_s0] sm:$0xff] }
  0x18   :  { %984 = vset.pattern.permute.xlu1 %v1252_v0  ;;  %983 = vset.pattern.permute.xlu0 %v1253_v1  ;;  %v1362_v4 = vld [vmem:[#allocation2] sm:$0xff]  ;;  %v1255_v6 = vmov 3   ;;  %v1256_v7 = vmov 4   ;;  %v1257_v8 = vmov 0.0   ;;  %v1258_v12 = vmov 5   ;;  %s882_s3 = sshll.u32 %s1629_s10, 4  ;;  %s883_s3 = int_to_ptr.hbm [resolvable:$true] %s882_s3 }
  0x19   :  { %985 = vset.pattern.permute.xlu2 %v1254_v2  ;;  %152 = vperm.xlu1 %984, %v1357_v3   ;;  %v1370_v5 = vld [vmem:[%s1621_s2] sm:$0xff]  ;;  %v1259_v16 = vmov 7   ;;  %v1260_v17 = vmov 6   ;;  %v1261_v18 = vmov 9   ;;  %v1262_v22 = vmov 11   ;;  %s1270_s16 = smov [#allocation12]  }
  0x1a   :  { %123 = vperm.xlu0 %983, %v1357_v3   ;;  %175 = vperm.xlu2 %985, %v1357_v3   ;;  %vm118_vm0 = vcmp.gt.f32.partialorder %v1370_v5, 0.0  ;;  %vm148_vm1 = vcmp.gt.f32.partialorder %v1370_v5, 1.0  ;;  %vm171_vm2 = vcmp.gt.f32.partialorder %v1370_v5, 2.0  ;;  %vm194_vm3 = vcmp.gt.f32.partialorder %v1370_v5, 3.0  ;;  %v1416_v34 = vld [vmem:[#allocation5] ss:$0 sm:$0xff] }
  0x1b   :  { %v916_v9 = vsel %vm118_vm0, 1.0, %v1257_v8  ;;  %v917_v10 = vsel %vm148_vm1, 1.0, %v1257_v8  ;;  %v918_v13 = vsel %vm171_vm2, 1.0, %v1257_v8  ;;  %v919_v14 = vsel %vm194_vm3, 1.0, %v1257_v8  ;;  %v1418_v35 = vld [vmem:[#allocation5 + $0x1] ss:$0 sm:$0xff] }
  0x1c   :  { %v991_v11 = vpack.i.bf16 %v917_v10, %v916_v9  ;;  %v998_v15 = vpack.i.bf16 %v919_v14, %v918_v13  ;;  %vm217_vm4 = vcmp.gt.f32.partialorder %v1370_v5, 4.0  ;;  %vm240_vm5 = vcmp.gt.f32.partialorder %v1370_v5, 5.0  ;;  %v1443_v56 = vld [vmem:[%s1623_s4] ss:$0 sm:$0xff]  ;;  %s890_s17 = sshll.u32 %s1270_s16, 4  ;;  %s892_s20 = sshll.u32 %s1630_s11, 4  ;;  %s891_s17 = int_to_ptr.vmem [resolvable:$true] %s890_s17  ;;  %s893_s20 = int_to_ptr.hbm [resolvable:$true] %s892_s20 }
  0x1d   :  { %v920_v19 = vsel %vm217_vm4, 1.0, %v1257_v8  ;;  %v921_v20 = vsel %vm240_vm5, 1.0, %v1257_v8  ;;  %v1263_v23 = vmov 8   ;;  %vm263_vm6 = vcmp.gt.f32.partialorder %v1370_v5, 6.0  ;;  %v529_v10 = vld [vmem:[#allocation7 + $0x70] sm:$0xff]  ;;  %s1271_s10 = smov 64  }
  0x1e   :  { %v1008_v21 = vpack.i.bf16 %v921_v20, %v920_v19  ;;  %vm286_vm7 = vcmp.gt.f32.partialorder %v1370_v5, 7.0  ;;  %v922_v24 = vsel %vm263_vm6, 1.0, %v1257_v8  ;;  %v1264_v27 = vmov 13   ;;  %s1272_s21 = smov 4  }
  0x1f   :  { %v923_v25 = vsel %vm286_vm7, 1.0, %v1257_v8  ;;  %v1265_v28 = vmov 10   ;;  %vm309_vm8 = vcmp.gt.f32.partialorder %v1370_v5, 8.0  ;;  %vm332_vm9 = vcmp.gt.f32.partialorder %v1370_v5, 9.0 }
  0x20   :  { %v1018_v26 = vpack.i.bf16 %v923_v25, %v922_v24  ;;  %v924_v29 = vsel %vm309_vm8, 1.0, %v1257_v8  ;;  %v925_v30 = vsel %vm332_vm9, 1.0, %v1257_v8  ;;  %v1266_v33 = vmov 15  }
  0x21   :  { %157 = vperm.xlu1 %984, %v1362_v4   ;;  %v1028_v31 = vpack.i.bf16 %v925_v30, %v924_v29  ;;  %v1267_v36 = vmov 12   ;;  %vm355_vm10 = vcmp.gt.f32.partialorder %v1370_v5, 10.0  ;;  %vm378_vm11 = vcmp.gt.f32.partialorder %v1370_v5, 11.0 }
  0x22   :  { %130 = vperm.xlu0 %983, %v1362_v4   ;;  %180 = vperm.xlu2 %985, %v1362_v4   ;;  %v926_v40 = vsel %vm355_vm10, 1.0, %v1257_v8  ;;  %v927_v41 = vsel %vm378_vm11, 1.0, %v1257_v8  ;;  %v493_v43 = vmax.f32 %v1370_v5, 1.0  ;;  %v1268_v50 = vmov 14  }
  0x23   :  { %v1038_v44 = vpack.i.bf16 %v927_v41, %v926_v40  ;;  %vm401_vm12 = vcmp.gt.f32.partialorder %v1370_v5, 12.0  ;;  %vm424_vm13 = vcmp.gt.f32.partialorder %v1370_v5, 13.0  ;;  %vm447_vm14 = vcmp.gt.f32.partialorder %v1370_v5, 14.0 }
  0x24   :  { %1065 = vrcp.f32 %v493_v43  ;;  %v928_v53 = vsel %vm401_vm12, 1.0, %v1257_v8  ;;  %v929_v54 = vsel %vm424_vm13, 1.0, %v1257_v8  ;;  %vm470_vm15 = vcmp.gt.f32.partialorder %v1370_v5, 15.0 }
  0x25   :  { %v1048_v58 = vpack.i.bf16 %v929_v54, %v928_v53  ;;  %vm499_vm0 = vweird.f32 %v493_v43  ;;  %v505_v0 = vand.u32 2147483648, %v493_v43  ;;  %v930_v13 = vsel %vm447_vm14, 1.0, %v1257_v8 }
  0x26   :  { %v931_v14 = vsel %vm470_vm15, 1.0, %v1257_v8 }
  0x29   :  { %987 = vset.pattern.permute.xlu1 %v1255_v6 }
  0x2a   :  { %986 = vset.pattern.permute.xlu0 %v1255_v6  ;;  %203 = vperm.xlu1 %987, %v1362_v4   ;;  %v1066_v46 = vpop.eup %1065 }
  0x2b   :  { %198 = vperm.xlu0 %986, %v1357_v3   ;;  %988 = vset.pattern.permute.xlu2 %v1256_v7  ;;  %v495_v47 = vmul.f32 %v1066_v46, %v493_v43  ;;  %vm500_vm1 = vweird.f32 %v1066_v46 }
  0x2c   :  { %221 = vperm.xlu2 %988, %v1357_v3   ;;  %vm1454_vm2 = vmor %vm499_vm0, %vm500_vm1 }
  0x2d   :  { %v496_v51 = vsub.f32 1.0, %v495_v47 }
  0x2f   :  { %v497_v55 = vmul.f32 %v1066_v46, %v496_v51 }
  0x31   :  { %v498_v2 = vadd.f32 %v1066_v46, %v497_v55 }
  0x32   :  { %989 = vset.pattern.permute.xlu1 %v1256_v7 }
  0x33   :  { %996 = vset.pattern.permute.xlu0 %v1258_v12  ;;  %226 = vperm.xlu1 %989, %v1362_v4  }
  0x34   :  { %244 = vperm.xlu0 %996, %v1357_v3   ;;  %990 = vset.pattern.permute.xlu2 %v1253_v1 }
  0x35   :  { %992 = vperm.xlu2 %990, %v991_v11  }
  0x3b   :  { %997 = vset.pattern.permute.xlu1 %v1258_v12 }
  0x3c   :  { %1005 = vset.pattern.permute.xlu0 %v1259_v16  ;;  %249 = vperm.xlu1 %997, %v1362_v4  }
  0x3d   :  { %290 = vperm.xlu0 %1005, %v1357_v3   ;;  %999 = vperm.xlu2 %990, %v998_v15  }
  0x44   :  { %1003 = vset.pattern.permute.xlu1 %v1260_v17 }
  0x45   :  { %1015 = vset.pattern.permute.xlu0 %v1261_v18  ;;  %267 = vperm.xlu1 %1003, %v1357_v3  }
  0x46   :  { %1004 = vset.pattern.permute.xlu2 %v1260_v17  ;;  %336 = vperm.xlu0 %1015, %v1357_v3   ;;  %v506_v17 = vor.u32 1.1754944e-38, %v505_v0 }
  0x47   :  { %272 = vperm.xlu2 %1004, %v1362_v4  }
  0x4d   :  { %1006 = vset.pattern.permute.xlu1 %v1259_v16 }
  0x4e   :  { %295 = vperm.xlu1 %1006, %v1362_v4   ;;  %1025 = vset.pattern.permute.xlu0 %v1262_v22 }
  0x4f   :  { %1007 = vset.pattern.permute.xlu2 %v1253_v1  ;;  %382 = vperm.xlu0 %1025, %v1357_v3  }
  0x50   :  { %1009 = vperm.xlu2 %1007, %v1008_v21  }
  0x56   :  { %1013 = vset.pattern.permute.xlu1 %v1263_v23 }
  0x57   :  { %313 = vperm.xlu1 %1013, %v1357_v3   ;;  %1035 = vset.pattern.permute.xlu0 %v1264_v27 }
  0x58   :  { %1014 = vset.pattern.permute.xlu2 %v1263_v23  ;;  %428 = vperm.xlu0 %1035, %v1357_v3   ;;  %v1054_v23 = vpack.i.bf16 %v931_v14, %v930_v13 }
  0x59   :  { %318 = vperm.xlu2 %1014, %v1362_v4  }
  0x5f   :  { %1016 = vset.pattern.permute.xlu1 %v1261_v18  ;;  %v502_v18 = vsel %vm1454_vm2, %v1066_v46, %v498_v2 }
  0x60   :  { %341 = vperm.xlu1 %1016, %v1362_v4   ;;  %1045 = vset.pattern.permute.xlu0 %v1266_v33 }
  0x61   :  { %1017 = vset.pattern.permute.xlu2 %v1253_v1  ;;  %474 = vperm.xlu0 %1045, %v1357_v3  }
  0x62   :  { %1019 = vperm.xlu2 %1017, %v1018_v26  }
  0x68   :  { %1023 = vset.pattern.permute.xlu1 %v1265_v28 }
  0x69   :  { %359 = vperm.xlu1 %1023, %v1357_v3   ;;  %1059 = vset.pattern.permute.xlu0 %v1253_v1 }
  0x6a   :  { %1024 = vset.pattern.permute.xlu2 %v1265_v28 }
  0x6b   :  { %364 = vperm.xlu2 %1024, %v1362_v4  }
  0x71   :  { %1026 = vset.pattern.permute.xlu1 %v1262_v22 }
  0x72   :  { %387 = vperm.xlu1 %1026, %v1362_v4  }
  0x73   :  { %1027 = vset.pattern.permute.xlu2 %v1253_v1 }
  0x74   :  { %1029 = vperm.xlu2 %1027, %v1028_v31   ;;  %v176_v32 = vpop.permute.xlu2 %175 }
  0x75   :  { %v178_v37 = vmul.f32 %v1416_v34, %v176_v32 }
  0x7a   :  { %1033 = vset.pattern.permute.xlu1 %v1267_v36 }
  0x7b   :  { %405 = vperm.xlu1 %1033, %v1357_v3  }
  0x7c   :  { %1034 = vset.pattern.permute.xlu2 %v1267_v36  ;;  %v181_v38 = vpop.permute.xlu2 %180 }
  0x7d   :  { %410 = vperm.xlu2 %1034, %v1362_v4   ;;  %v183_v39 = vmul.f32 %v1418_v35, %v181_v38 }
  0x7f   :  { %v184_v42 = vadd.f32 %v183_v39, %v178_v37 }
  0x81   :  { %v185_v6 = vadd.f32 %v1443_v56, %v184_v42 }
  0x83   :  { %1036 = vset.pattern.permute.xlu1 %v1264_v27  ;;  %v186_v19 = vmax.f32 %v185_v6, 0.0 }
  0x84   :  { %433 = vperm.xlu1 %1036, %v1362_v4  }
  0x85   :  { %1037 = vset.pattern.permute.xlu2 %v1253_v1 }
  0x86   :  { %1039 = vperm.xlu2 %1037, %v1038_v44   ;;  %v1432_v45 = vpop.permute.xlu2 %221 }
  0x87   :  { %v224_v41 = vmul.f32 %v1416_v34, %v1432_v45 }
  0x8b   :  { %v153_v48 = vpop.permute.xlu1 %152 }
  0x8c   :  { %v124_v49 = vpop.permute.xlu0 %123  ;;  %1043 = vset.pattern.permute.xlu1 %v1268_v50  ;;  %v155_v61 = vmul.f32 %v1416_v34, %v153_v48 }
  0x8d   :  { %451 = vperm.xlu1 %1043, %v1357_v3   ;;  %v127_v57 = vmul.f32 %v1416_v34, %v124_v49  ;;  %v503_v3 = vand.u32 2147483647, %v493_v43 }
  0x8e   :  { %1044 = vset.pattern.permute.xlu2 %v1268_v50 }
  0x8f   :  { %456 = vperm.xlu2 %1044, %v1362_v4   ;;  %v993_v52 = vpop.permute.xlu2 %992  ;;  %vm504_vm3 = vcmp.eq.f32.partialorder %v503_v3, 8.507059e+37 }
  0x90   :  { %v995_v11 = vunpack.i.h.bf16 %v993_v52  ;;  %v994_v15 = vunpack.i.l.bf16 %v993_v52  ;;  %v507_v8 = vsel %vm504_vm3, %v506_v17, %v502_v18  ;;  %v524_v17 = vld [vmem:[#allocation7 + $0x48] sm:$0xff]  ;;  %v523_v18 = vld [vmem:[#allocation7 + $0x40] sm:$0xff] }
  0x93   :  { %v158_v59 = vpop.permute.xlu1 %157 }
  0x94   :  { %v131_v60 = vpop.permute.xlu0 %130  ;;  %v160_v62 = vmul.f32 %v1418_v35, %v158_v59 }
  0x95   :  { %v134_v63 = vmul.f32 %v1418_v35, %v131_v60  ;;  %1046 = vset.pattern.permute.xlu1 %v1266_v33 }
  0x96   :  { %v161_v7 = vadd.f32 %v160_v62, %v155_v61  ;;  %479 = vperm.xlu1 %1046, %v1362_v4  }
  0x97   :  { %v135_v9 = vadd.f32 %v134_v63, %v127_v57  ;;  %1047 = vset.pattern.permute.xlu2 %v1253_v1  ;;  %v1000_v12 = vpop.permute.xlu2 %999 }
  0x98   :  { %1049 = vperm.xlu2 %1047, %v1048_v58   ;;  %v162_v4 = vadd.f32 %v1443_v56, %v161_v7  ;;  %v1001_v22 = vunpack.i.l.bf16 %v1000_v12  ;;  %v1002_v36 = vunpack.i.h.bf16 %v1000_v12  ;;  %v527_v12 = vld [vmem:[#allocation7 + $0x60] sm:$0xff] }
  0x99   :  { %v139_v16 = vadd.f32 %v1443_v56, %v135_v9  ;;  %v530_v9 = vld [vmem:[#allocation7 + $0x78] sm:$0xff] }
  0x9a   :  { %v163_v20 = vmax.f32 %v162_v4, 0.0  ;;  %v192_v30 = vmul.f32 %v1001_v22, %v186_v19  ;;  %535 = vmatpush.msra.mxu0 %v530_v9 }
  0x9b   :  { %v140_v21 = vmax.f32 %v139_v16, 0.0  ;;  %v525_v16 = vld [vmem:[#allocation7 + $0x50] sm:$0xff] }
  0x9c   :  { %v169_v24 = vmul.f32 %v995_v11, %v163_v20  ;;  %v204_v26 = vpop.permute.xlu1 %203  ;;  %536 = vmatpush.msra.mxu0 %v529_v10  ;;  %v528_v11 = vld [vmem:[#allocation7 + $0x68] sm:$0xff]  ;;  %v522_v20 = vld [vmem:[#allocation7 + $0x38] sm:$0xff] }
  0x9d   :  { %v146_v25 = vmul.f32 %v994_v15, %v140_v21  ;;  %v199_v5 = vpop.permute.xlu0 %198  ;;  %v206_v27 = vmul.f32 %v1418_v35, %v204_v26  ;;  %v526_v15 = vld [vmem:[#allocation7 + $0x58] sm:$0xff] }
  0x9e   :  { %v201_v28 = vmul.f32 %v1416_v34, %v199_v5  ;;  %1053 = vset.pattern.permute.xlu1 %v1253_v1  ;;  %537 = vmatpush.msra.mxu0 %v528_v11  ;;  %v519_v5 = vld [vmem:[#allocation7 + $0x20] sm:$0xff] }
  0x9f   :  { %v170_v29 = vadd.f32 %v169_v24, %v146_v25  ;;  %1055 = vperm.xlu1 %1053, %v1054_v23   ;;  %v521_v23 = vld [vmem:[#allocation7 + $0x30] sm:$0xff]  ;;  %v520_v24 = vld [vmem:[#allocation7 + $0x28] sm:$0xff]  ;;  %v567_v11 = vld [vmem:[#allocation8 + $0x60] sm:$0xff] }
  0xa0   :  { %v207_v31 = vadd.f32 %v206_v27, %v201_v28  ;;  %511 = vperm.xlu2 %1047, %v507_v8   ;;  %538 = vmatpush.msra.mxu0 %v527_v12  ;;  %v518_v28 = vld [vmem:[#allocation7 + $0x18] sm:$0xff] }
  0xa1   :  { %v193_v32 = vadd.f32 %v192_v30, %v170_v29  ;;  %v273_v33 = vpop.permute.xlu2 %272  ;;  %v517_v29 = vld [vmem:[#allocation7 + $0x10] sm:$0xff] }
  0xa2   :  { %v208_v37 = vadd.f32 %v1443_v56, %v207_v31  ;;  %539 = vmatpush.msra.mxu0 %v526_v15  ;;  %v275_v25 = vmul.f32 %v1418_v35, %v273_v33 }
  0xa4   :  { %v209_v38 = vmax.f32 %v208_v37, 0.0  ;;  %540 = vmatpush.msra.mxu0 %v525_v16 }
  0xa5   :  { %v227_v40 = vpop.permute.xlu1 %226 }
  0xa6   :  { %v215_v39 = vmul.f32 %v1002_v36, %v209_v38  ;;  %v229_v42 = vmul.f32 %v1418_v35, %v227_v40  ;;  %v245_v48 = vpop.permute.xlu0 %244  ;;  %541 = vmatpush.msra.mxu0 %v524_v17  ;;  %v516_v38 = vld [vmem:[#allocation7 + $0x8] sm:$0xff] }
  0xa7   :  { %v247_v50 = vmul.f32 %v1416_v34, %v245_v48 }
  0xa8   :  { %v216_v43 = vadd.f32 %v215_v39, %v193_v32  ;;  %v230_v44 = vadd.f32 %v229_v42, %v224_v41  ;;  %542 = vmatpush.msra.mxu0 %v523_v18  ;;  %v515_v42 = vld [vmem:[#allocation7] sm:$0xff] }
  0xaa   :  { %v1010_v46 = vpop.permute.xlu2 %1009  ;;  %v231_v1 = vadd.f32 %v1443_v56, %v230_v44  ;;  %543 = vmatpush.msra.mxu0 %v522_v20 }
  0xab   :  { %v1011_v47 = vunpack.i.l.bf16 %v1010_v46  ;;  %v1012_v57 = vunpack.i.h.bf16 %v1010_v46 }
  0xac   :  { %v232_v49 = vmax.f32 %v231_v1, 0.0  ;;  %544 = vmatpush.msra.mxu0 %v521_v23 }
  0xae   :  { %v238_v51 = vmul.f32 %v1011_v47, %v232_v49  ;;  %v250_v52 = vpop.permute.xlu1 %249  ;;  %545 = vmatpush.msra.mxu0 %v520_v24 }
  0xaf   :  { %v252_v53 = vmul.f32 %v1418_v35, %v250_v52  ;;  %v291_v4 = vpop.permute.xlu0 %290  ;;  %v569_v52 = vld [vmem:[#allocation8 + $0x70] sm:$0xff] }
  0xb0   :  { %v239_v54 = vadd.f32 %v238_v51, %v216_v43  ;;  %v293_v27 = vmul.f32 %v1416_v34, %v291_v4  ;;  %546 = vmatpush.msra.mxu0 %v519_v5  ;;  %v570_v51 = vld [vmem:[#allocation8 + $0x78] sm:$0xff] }
  0xb1   :  { %v253_v55 = vadd.f32 %v252_v53, %v247_v50  ;;  %571 = vmatpush.msra.mxu1 %v570_v51  ;;  %v561_v51 = vld [vmem:[#allocation8 + $0x30] sm:$0xff] }
  0xb2   :  { %547 = vmatpush.msra.mxu0 %v518_v28  ;;  %v564_v28 = vld [vmem:[#allocation8 + $0x48] sm:$0xff] }
  0xb3   :  { %v254_v45 = vadd.f32 %v1443_v56, %v253_v55  ;;  %v319_v63 = vpop.permute.xlu2 %318  ;;  %572 = vmatpush.msra.mxu1 %v569_v52 }
  0xb4   :  { %v321_v30 = vmul.f32 %v1418_v35, %v319_v63  ;;  %548 = vmatpush.msra.mxu0 %v517_v29 }
  0xb5   :  { %v255_v58 = vmax.f32 %v254_v45, 0.0 }
  0xb6   :  { %549 = vmatpush.msra.mxu0 %v516_v38 }
  0xb7   :  { %v261_v59 = vmul.f32 %v1012_v57, %v255_v58  ;;  %v268_v60 = vpop.permute.xlu1 %267 }
  0xb8   :  { %v337_v21 = vpop.permute.xlu0 %336  ;;  %v270_v26 = vmul.f32 %v1416_v34, %v268_v60  ;;  %550 = vmatpush.msra.mxu0 %v515_v42 }
  0xb9   :  { %v1479_v61 = vadd.f32 %v261_v59, %v239_v54  ;;  %v339_v41 = vmul.f32 %v1416_v34, %v337_v21 }
  0xba   :  { %v276_v31 = vadd.f32 %v275_v25, %v270_v26 }
  0xbc   :  { %v1481_v2 = vpop.permute.xlu2 %1019  ;;  %v277_v43 = vadd.f32 %v1443_v56, %v276_v31 }
  0xbd   :  { %v1021_v54 = vunpack.i.l.bf16 %v1481_v2  ;;  %v1022_v63 = vunpack.i.h.bf16 %v1481_v2  ;;  %v566_v2 = vld [vmem:[#allocation8 + $0x58] sm:$0xff] }
  0xbe   :  { %v278_v53 = vmax.f32 %v277_v43, 0.0 }
  0xc0   :  { %v296_v62 = vpop.permute.xlu1 %295  ;;  %v284_v12 = vmul.f32 %v1021_v54, %v278_v53  ;;  %v560_v54 = vld [vmem:[#allocation8 + $0x28] sm:$0xff] }
  0xc1   :  { %v298_v8 = vmul.f32 %v1418_v35, %v296_v62  ;;  %v383_v37 = vpop.permute.xlu0 %382  ;;  %v568_v62 = vld [vmem:[#allocation8 + $0x68] sm:$0xff] }
  0xc2   :  { %v385_v50 = vmul.f32 %v1416_v34, %v383_v37  ;;  %573 = vmatpush.msra.mxu1 %v568_v62  ;;  %v285_v23 = vadd.f32 %v284_v12, %v1479_v61 }
  0xc3   :  { %v299_v39 = vadd.f32 %v298_v8, %v293_v27 }
  0xc4   :  { %574 = vmatpush.msra.mxu1 %v567_v11 }
  0xc5   :  { %v365_v6 = vpop.permute.xlu2 %364  ;;  %v300_v47 = vadd.f32 %v1443_v56, %v299_v39  ;;  %v563_v39 = vld [vmem:[#allocation8 + $0x40] sm:$0xff] }
  0xc6   :  { %v367_v46 = vmul.f32 %v1418_v35, %v365_v6  ;;  %575 = vmatpush.msra.mxu1 %v566_v2 }
  0xc9   :  { %v314_v0 = vpop.permute.xlu1 %313 }
  0xca   :  { %v316_v32 = vmul.f32 %v1416_v34, %v314_v0  ;;  %v429_v45 = vpop.permute.xlu0 %428  ;;  %v301_v0 = vmax.f32 %v300_v47, 0.0 }
  0xcb   :  { %v431_v10 = vmul.f32 %v1416_v34, %v429_v45  ;;  %v559_v45 = vld [vmem:[#allocation8 + $0x20] sm:$0xff] }
  0xcc   :  { %v322_v44 = vadd.f32 %v321_v30, %v316_v32  ;;  %v307_v17 = vmul.f32 %v1022_v63, %v301_v0  ;;  %v558_v0 = vld [vmem:[#allocation8 + $0x18] sm:$0xff] }
  0xce   :  { %v1483_v13 = vpop.permute.xlu2 %1029  ;;  %v323_v55 = vadd.f32 %v1443_v56, %v322_v44  ;;  %v308_v29 = vadd.f32 %v307_v17, %v285_v23 }
  0xcf   :  { %v1031_v15 = vunpack.i.l.bf16 %v1483_v13  ;;  %v1032_v18 = vunpack.i.h.bf16 %v1483_v13 }
  0xd2   :  { %v342_v3 = vpop.permute.xlu1 %341 }
  0xd3   :  { %v344_v40 = vmul.f32 %v1418_v35, %v342_v3  ;;  %v475_v26 = vpop.permute.xlu0 %474 }
  0xd4   :  { %v477_v38 = vmul.f32 %v1416_v34, %v475_v26 }
  0xd5   :  { %v345_v48 = vadd.f32 %v344_v40, %v339_v41 }
  0xd7   :  { %v411_v19 = vpop.permute.xlu2 %410  ;;  %v346_v3 = vadd.f32 %v1443_v56, %v345_v48 }
  0xd8   :  { %v413_v58 = vmul.f32 %v1418_v35, %v411_v19 }
  0xd9   :  { %v347_v19 = vmax.f32 %v346_v3, 0.0 }
  0xdb   :  { %v360_v7 = vpop.permute.xlu1 %359  ;;  %v353_v30 = vmul.f32 %v1032_v18, %v347_v19  ;;  %v599_v19 = vld [vmem:[#allocation10] sm:$0xff] }
  0xdc   :  { %v362_v1 = vmul.f32 %v1416_v34, %v360_v7 }
  0xde   :  { %v368_v59 = vadd.f32 %v367_v46, %v362_v1  ;;  %v562_v1 = vld [vmem:[#allocation8 + $0x38] sm:$0xff] }
  0xe0   :  { %v1491_v36 = vpop.permute.xlu2 %1039  ;;  %v369_v4 = vadd.f32 %v1443_v56, %v368_v59 }
  0xe1   :  { %v1041_v25 = vunpack.i.l.bf16 %v1491_v36  ;;  %v1042_v32 = vunpack.i.h.bf16 %v1491_v36 }
  0xe2   :  { %v370_v5 = vmax.f32 %v369_v4, 0.0  ;;  %v555_v4 = vld [vmem:[#allocation8] sm:$0xff] }
  0xe4   :  { %v388_v14 = vpop.permute.xlu1 %387  ;;  %v376_v42 = vmul.f32 %v1041_v25, %v370_v5 }
  0xe5   :  { %v390_v49 = vmul.f32 %v1418_v35, %v388_v14  ;;  %v324_v14 = vmax.f32 %v323_v55, 0.0 }
  0xe7   :  { %v391_v7 = vadd.f32 %v390_v49, %v385_v50  ;;  %v330_v24 = vmul.f32 %v1031_v15, %v324_v14  ;;  %v556_v15 = vld [vmem:[#allocation8 + $0x8] sm:$0xff] }
  0xe9   :  { %v457_v57 = vpop.permute.xlu2 %456  ;;  %v392_v20 = vadd.f32 %v1443_v56, %v391_v7  ;;  %v331_v40 = vadd.f32 %v330_v24, %v308_v29 }
  0xea   :  { %v459_v8 = vmul.f32 %v1418_v35, %v457_v57 }
  0xeb   :  { %v393_v61 = vmax.f32 %v392_v20, 0.0  ;;  %v354_v47 = vadd.f32 %v353_v30, %v331_v40 }
  0xed   :  { %v406_v22 = vpop.permute.xlu1 %405  ;;  %v399_v48 = vmul.f32 %v1042_v32, %v393_v61  ;;  %v377_v52 = vadd.f32 %v376_v42, %v354_v47 }
  0xee   :  { %v408_v60 = vmul.f32 %v1416_v34, %v406_v22  ;;  %v565_v22 = vld [vmem:[#allocation8 + $0x50] sm:$0xff] }
  0xef   :  { %576 = vmatpush.msra.mxu1 %v565_v22 }
  0xf0   :  { %v414_v16 = vadd.f32 %v413_v58, %v408_v60 }
  0xf1   :  { %577 = vmatpush.msra.mxu1 %v564_v28 }
  0xf2   :  { %v415_v27 = vadd.f32 %v1443_v56, %v414_v16  ;;  %v1050_v31 = vpop.permute.xlu2 %1049  ;;  %v1063_v16 = vld [vmem:[%s1625_s6] ss:$0 sm:$0xff] }
  0xf3   :  { %v1051_v44 = vunpack.i.l.bf16 %v1050_v31  ;;  %578 = vmatpush.msra.mxu1 %v563_v39  ;;  %v1052_v36 = vunpack.i.h.bf16 %v1050_v31 }
  0xf4   :  { %v416_v43 = vmax.f32 %v415_v27, 0.0 }
  0xf5   :  { %579 = vmatpush.msra.mxu1 %v562_v1  ;;  %v640_v1 = vlaneseq }
  0xf6   :  { %v434_v33 = vpop.permute.xlu1 %433 }
  0xf7   :  { %v436_v9 = vmul.f32 %v1418_v35, %v434_v33  ;;  %580 = vmatpush.msra.mxu1 %v561_v51  ;;  %v1527_v47 = vand.u32 127, %v640_v1 }
  0xf9   :  { %v437_v21 = vadd.f32 %v436_v9, %v431_v10  ;;  %581 = vmatpush.msra.mxu1 %v560_v54  ;;  %v557_v9 = vld [vmem:[#allocation8 + $0x10] sm:$0xff] }
  0xfa   :  { %v512_v14 = vpop.permute.xlu2 %511 }
  0xfb   :  { %v438_v37 = vadd.f32 %v1443_v56, %v437_v21  ;;  %582 = vmatpush.msra.mxu1 %v559_v45 }
  0xfd   :  { %v439_v49 = vmax.f32 %v438_v37, 0.0  ;;  %583 = vmatpush.msra.mxu1 %v558_v0 }
  0xff   :  { %v452_v6 = vpop.permute.xlu1 %451  ;;  %v445_v55 = vmul.f32 %v1052_v36, %v439_v49  ;;  %584 = vmatpush.msra.mxu1 %v557_v9 }
 0x100   :  { %v454_v13 = vmul.f32 %v1416_v34, %v452_v6  ;;  %v422_v34 = vmul.f32 %v1051_v44, %v416_v43 }
 0x101   :  { %585 = vmatpush.msra.mxu1 %v556_v15 }
 0x102   :  { %v460_v46 = vadd.f32 %v459_v8, %v454_v13 }
 0x103   :  { %586 = vmatpush.msra.mxu1 %v555_v4 }
 0x104   :  { %v461_v53 = vadd.f32 %v1443_v56, %v460_v46 }
 0x106   :  { %v462_v60 = vmax.f32 %v461_v53, 0.0 }
 0x108   :  { %v480_v33 = vpop.permute.xlu1 %479 }
 0x109   :  { %v482_v41 = vmul.f32 %v1418_v35, %v480_v33  ;;  %v400_v35 = vadd.f32 %v399_v48, %v377_v52 }
 0x10b   :  { %v483_v50 = vadd.f32 %v482_v41, %v477_v38  ;;  %v423_v59 = vadd.f32 %v422_v34, %v400_v35 }
 0x10d   :  { %v484_v57 = vadd.f32 %v1443_v56, %v483_v50  ;;  %v446_v7 = vadd.f32 %v445_v55, %v423_v59 }
 0x10f   :  { %v485_v3 = vmax.f32 %v484_v57, 0.0 }
 0x111   :  { %v1056_v58 = vpop.permute.xlu1 %1055 }
 0x112   :  { %v1058_v62 = vunpack.i.h.bf16 %v1056_v58  ;;  %v1057_v63 = vunpack.i.l.bf16 %v1056_v58 }
 0x114   :  { %v468_v6 = vmul.f32 %v1057_v63, %v462_v60  ;;  %v491_v10 = vmul.f32 %v1058_v62, %v485_v3 }
 0x116   :  { %v469_v11 = vadd.f32 %v468_v6, %v446_v7 }
 0x118   :  { %v492_v12 = vadd.f32 %v491_v10, %v469_v11 }
 0x11a   :  { %v514_v56 = vmul.f32 %v512_v14, %v492_v12 }
 0x11c   :  { %551 = vmatmul.f32.vlgmr.msra.gmra.mxu0 %v514_v56 }
 0x199   :  { %v552_v2 = vpop.f32.mrf.mxu0 }
 0x19a   :  { %v553_v17 = vadd.f32 %v1063_v16, %v552_v2 }
 0x19c   :  { %587 = vmatmul.f32.vlgmr.msra.gmra.mxu1 %v553_v17 }
 0x219   :  { %v588_v18 = vpop.f32.mrf.mxu1 }
 0x21a   :  { %v600_v20 = vperm.slane %v588_v18, 0  ;;  %v593_v21 = vrot.slane %v588_v18, 2  ;;  %v592_v22 = vrot.slane %v588_v18, 1  ;;  %v595_v23 = vrot.slane %v588_v18, 4 }
 0x21b   :  { %v594_v24 = vrot.slane %v588_v18, 3  ;;  %v596_v25 = vrot.slane %v588_v18, 5  ;;  %v598_v26 = vrot.slane %v588_v18, 7  ;;  %v597_v5 = vrot.slane %v588_v18, 6 }
 0x21c   :  { %v616_v8 = vadd.f32 %v600_v20, %v599_v19  ;;  %v602_v27 = vperm.slane %v593_v21, 0  ;;  %v601_v13 = vperm.slane %v592_v22, 0  ;;  %v604_v28 = vperm.slane %v595_v23, 0 }
 0x21d   :  { %v603_v29 = vperm.slane %v594_v24, 0  ;;  %v605_v30 = vperm.slane %v596_v25, 0  ;;  %v607_v31 = vperm.slane %v598_v26, 0  ;;  %v606_v32 = vperm.slane %v597_v5, 0 }
 0x21e   :  { %642 = vmax.xlane.f32.xlu0 %v616_v8  ;;  %v618_v61 = vadd.f32 %v602_v27, %v599_v19  ;;  %v617_v37 = vadd.f32 %v601_v13, %v599_v19  ;;  %v620_v33 = vadd.f32 %v604_v28, %v599_v19 }
 0x21f   :  { %v619_v38 = vadd.f32 %v603_v29, %v599_v19  ;;  %v621_v39 = vadd.f32 %v605_v30, %v599_v19  ;;  %v623_v40 = vadd.f32 %v607_v31, %v599_v19  ;;  %v622_v41 = vadd.f32 %v606_v32, %v599_v19 }
 0x220   :  { %646 = vmax.xlane.f32.xlu2 %v618_v61  ;;  %644 = vmax.xlane.f32.xlu1 %v617_v37  ;;  %v935_v42 = vpack.c.bf16 %v617_v37, %v616_v8 }
 0x221   :  { %v940_v43 = vpack.c.bf16 %v619_v38, %v618_v61  ;;  %v945_v44 = vpack.c.bf16 %v621_v39, %v620_v33  ;;  %v950_v46 = vpack.c.bf16 %v623_v40, %v622_v41 }
 0x222   :  { %936 = vst [vmem:[#allocation12] sm:$0xff] %v935_v42  }
 0x223   :  { %952 = vst [vmem:[#allocation12 + $0x8] sm:$0xff] %v940_v43  }
 0x224   :  { %953 = vst [vmem:[#allocation12 + $0x10] sm:$0xff] %v945_v44  }
 0x225   :  { %954 = vst [vmem:[#allocation12 + $0x18] sm:$0xff] %v950_v46  }
 0x226   :  { %650 = vmax.xlane.f32.xlu0 %v620_v33  ;;  %898 = dma.vmem_to_hbm [thread:$0]  %s891_s17, 512, %s893_s20, [#allocation13], %s1271_s10, %s1271_s10, %s1272_s21  }
 0x228   :  { %648 = vmax.xlane.f32.xlu2 %v619_v38  ;;  %652 = vmax.xlane.f32.xlu1 %v621_v39 }
 0x22e   :  { %656 = vmax.xlane.f32.xlu0 %v623_v40 }
 0x230   :  { %654 = vmax.xlane.f32.xlu2 %v622_v41 }
 0x291   :  { %v643_v48 = vpop.xlane.xlu0 %642 }
 0x292   :  { %vm658_vm4 = vcmp.eq.f32.partialorder %v616_v8, %v643_v48 }
 0x293   :  { %v666_v36 = vsel %vm658_vm4, %v1527_v47, 128  ;;  %v647_v49 = vpop.xlane.xlu2 %646  ;;  %v645_v50 = vpop.xlane.xlu1 %644 }
 0x294   :  { %vm660_vm5 = vcmp.eq.f32.partialorder %v618_v61, %v647_v49  ;;  %vm659_vm6 = vcmp.eq.f32.partialorder %v617_v37, %v645_v50  ;;  %v675_v51 = vshra.s32 %v666_v36, 16  ;;  %v674_v17 = vand.u32 65535, %v666_v36 }
 0x295   :  { %v668_v52 = vsel %vm660_vm5, %v1527_v47, 128  ;;  %v667_v34 = vsel %vm659_vm6, %v1527_v47, 128  ;;  %vm794_vm6 = vcmask 1041409  }
 0x296   :  { %v677_v53 = vcvt.s32.f32 %v675_v51  ;;  %v703_v54 = vshra.s32 %v668_v52, 16  ;;  %v689_v35 = vshra.s32 %v667_v34, 16  ;;  %v702_v18 = vand.u32 65535, %v668_v52 }
 0x297   :  { %v688_v19 = vand.u32 65535, %v667_v34  ;;  %v676_v21 = vcvt.s32.f32 %v674_v17 }
 0x298   :  { %678 = vmin.xlane.f32.xlu1 %v677_v53  ;;  %v705_v55 = vcvt.s32.f32 %v703_v54  ;;  %v691_v45 = vcvt.s32.f32 %v689_v35  ;;  %v704_v24 = vcvt.s32.f32 %v702_v18  ;;  %v1555_v54 = vld [vmem:[%s1628_s9] ss:$0 sm:$0xff]  ;;  %s1269_s9 = smov [#allocation11]  }
 0x299   :  { %v651_v57 = vpop.xlane.xlu0 %650  ;;  %v690_v26 = vcvt.s32.f32 %v688_v19  ;;  %s880_s13 = sshll.u32 %s1269_s9, 4  ;;  %s881_s13 = int_to_ptr.vmem [resolvable:$true] %s880_s13 }
 0x29a   :  { %vm662_vm7 = vcmp.eq.f32.partialorder %v620_v33, %v651_v57  ;;  %706 = vmin.xlane.f32.xlu0 %v705_v55  ;;  %692 = vmin.xlane.f32.xlu2 %v691_v45 }
 0x29b   :  { %v670_v58 = vsel %vm662_vm7, %v1527_v47, 128  ;;  %v649_v59 = vpop.xlane.xlu2 %648  ;;  %v653_v60 = vpop.xlane.xlu1 %652  ;;  %vm796_vm7 = vcmask 1042434  }
 0x29c   :  { %vm661_vm8 = vcmp.eq.f32.partialorder %v619_v38, %v649_v59  ;;  %vm663_vm9 = vcmp.eq.f32.partialorder %v621_v39, %v653_v60  ;;  %v731_v0 = vshra.s32 %v670_v58, 16  ;;  %v730_v27 = vand.u32 65535, %v670_v58 }
 0x29d   :  { %v669_v62 = vsel %vm661_vm8, %v1527_v47, 128  ;;  %v671_v63 = vsel %vm663_vm9, %v1527_v47, 128  ;;  %vm798_vm9 = vcmask 1043459  }
 0x29e   :  { %v717_v3 = vshra.s32 %v669_v62, 16  ;;  %v745_v6 = vshra.s32 %v671_v63, 16  ;;  %v733_v10 = vcvt.s32.f32 %v731_v0  ;;  %v716_v13 = vand.u32 65535, %v669_v62 }
 0x29f   :  { %v744_v28 = vand.u32 65535, %v671_v63  ;;  %v732_v32 = vcvt.s32.f32 %v730_v27 }
 0x2a0   :  { %v719_v7 = vcvt.s32.f32 %v717_v3  ;;  %v747_v11 = vcvt.s32.f32 %v745_v6  ;;  %v718_v37 = vcvt.s32.f32 %v716_v13 }
 0x2a1   :  { %v657_v9 = vpop.xlane.xlu0 %656  ;;  %v746_v61 = vcvt.s32.f32 %v744_v28 }
 0x2a2   :  { %vm665_vm10 = vcmp.eq.f32.partialorder %v623_v40, %v657_v9  ;;  %720 = vmin.xlane.f32.xlu1 %v719_v7  ;;  %734 = vmin.xlane.f32.xlu2 %v733_v10 }
 0x2a3   :  { %v673_v12 = vsel %vm665_vm10, %v1527_v47, 128  ;;  %748 = vmin.xlane.f32.xlu0 %v747_v11  ;;  %v655_v14 = vpop.xlane.xlu2 %654 }
 0x2a4   :  { %vm664_vm11 = vcmp.eq.f32.partialorder %v622_v41, %v655_v14  ;;  %v773_v15 = vshra.s32 %v673_v12, 16  ;;  %v772_v41 = vand.u32 65535, %v673_v12 }
 0x2a5   :  { %v672_v56 = vsel %vm664_vm11, %v1527_v47, 128 }
 0x2a6   :  { %v759_v4 = vshra.s32 %v672_v56, 16  ;;  %v775_v2 = vcvt.s32.f32 %v773_v15  ;;  %v758_v40 = vand.u32 65535, %v672_v56  ;;  %v774_v46 = vcvt.s32.f32 %v772_v41 }
 0x2a8   :  { %v761_v16 = vcvt.s32.f32 %v759_v4  ;;  %v760_v43 = vcvt.s32.f32 %v758_v40 }
 0x2aa   :  { %762 = vmin.xlane.f32.xlu1 %v761_v16  ;;  %776 = vmin.xlane.f32.xlu2 %v775_v2 }
 0x30b   :  { %v679_v20 = vpop.xlane.xlu1 %678 }
 0x30c   :  { %vm680_vm12 = vcmp.eq.f32.partialorder %v677_v53, %v679_v20  ;;  %v685_v36 = vcvt.f32.s32 %v679_v20 }
 0x30d   :  { %v707_v22 = vpop.xlane.xlu0 %706  ;;  %v681_v23 = vsel %vm680_vm12, %v676_v21, inf  ;;  %v693_v25 = vpop.xlane.xlu2 %692  ;;  %vm800_vm12 = vcmask 1044484  }
 0x30e   :  { %682 = vmin.xlane.f32.xlu0 %v681_v23  ;;  %vm708_vm13 = vcmp.eq.f32.partialorder %v705_v55, %v707_v22  ;;  %vm694_vm14 = vcmp.eq.f32.partialorder %v691_v45, %v693_v25  ;;  %v713_v49 = vcvt.f32.s32 %v707_v22  ;;  %v699_v50 = vcvt.f32.s32 %v693_v25 }
 0x30f   :  { %v709_v5 = vsel %vm708_vm13, %v704_v24, inf  ;;  %v695_v8 = vsel %vm694_vm14, %v690_v26, inf  ;;  %v686_v52 = vshll.u32 %v685_v36, 16  ;;  %vm802_vm14 = vcmask 1045509  }
 0x310   :  { %710 = vmin.xlane.f32.xlu2 %v709_v5  ;;  %696 = vmin.xlane.f32.xlu1 %v695_v8  ;;  %v714_v35 = vshll.u32 %v713_v49, 16  ;;  %v700_v58 = vshll.u32 %v699_v50, 16 }
 0x315   :  { %v1537_v29 = vpop.xlane.xlu1 %720  ;;  %v1539_v30 = vpop.xlane.xlu2 %734 }
 0x316   :  { %v1541_v31 = vpop.xlane.xlu0 %748  ;;  %vm722_vm15 = vcmp.eq.f32.partialorder %v719_v7, %v1537_v29  ;;  %vm736_vm0 = vcmp.eq.f32.partialorder %v733_v10, %v1539_v30  ;;  %v741_v62 = vcvt.f32.s32 %v1539_v30 }
 0x317   :  { %vm750_vm1 = vcmp.eq.f32.partialorder %v747_v11, %v1541_v31  ;;  %v737_v33 = vsel %vm736_vm0, %v732_v32, inf  ;;  %v723_v39 = vsel %vm722_vm15, %v718_v37, inf  ;;  %v755_v63 = vcvt.f32.s32 %v1541_v31 }
 0x318   :  { %v751_v38 = vsel %vm750_vm1, %v746_v61, inf  ;;  %738 = vmin.xlane.f32.xlu1 %v737_v33  ;;  %724 = vmin.xlane.f32.xlu0 %v723_v39  ;;  %v727_v11 = vcvt.f32.s32 %v1537_v29  ;;  %vm804_vm0 = vcmask 1046534  }
 0x319   :  { %752 = vmin.xlane.f32.xlu2 %v751_v38 }
 0x31a   :  { %v728_v20 = vshll.u32 %v727_v11, 16 }
 0x31d   :  { %v1546_v42 = vpop.xlane.xlu1 %762  ;;  %v1548_v44 = vpop.xlane.xlu2 %776 }
 0x31e   :  { %vm764_vm2 = vcmp.eq.f32.partialorder %v761_v16, %v1546_v42  ;;  %vm778_vm3 = vcmp.eq.f32.partialorder %v775_v2, %v1548_v44  ;;  %v742_v16 = vshll.u32 %v741_v62, 16  ;;  %v756_v2 = vshll.u32 %v755_v63, 16 }
 0x31f   :  { %v765_v1 = vsel %vm764_vm2, %v760_v43, inf  ;;  %v779_v48 = vsel %vm778_vm3, %v774_v46, inf  ;;  %v783_v24 = vcvt.f32.s32 %v1548_v44  ;;  %v769_v25 = vcvt.f32.s32 %v1546_v42 }
 0x320   :  { %780 = vmin.xlane.f32.xlu1 %v779_v48  ;;  %766 = vmin.xlane.f32.xlu0 %v765_v1  ;;  %vm806_vm2 = vcmask 1047559   ;;  %vm808_vm3 = vcmask 64512  }
 0x321   :  { %v784_v31 = vshll.u32 %v783_v24, 16  ;;  %v770_v33 = vshll.u32 %v769_v25, 16 }
 0x381   :  { %v683_v51 = vpop.xlane.xlu0 %682 }
 0x382   :  { %v684_v34 = vcvt.f32.s32 %v683_v51 }
 0x383   :  { %v711_v53 = vpop.xlane.xlu2 %710  ;;  %v697_v45 = vpop.xlane.xlu1 %696 }
 0x384   :  { %v687_v55 = vadd.s32 %v686_v52, %v684_v34  ;;  %v712_v57 = vcvt.f32.s32 %v711_v53  ;;  %v698_v59 = vcvt.f32.s32 %v697_v45 }
 0x386   :  { %v715_v60 = vadd.s32 %v714_v35, %v712_v57  ;;  %vm811_vm4 = vcmp.eq.s32.totalorder %v1527_v47, %v687_v55  ;;  %v701_v0 = vadd.s32 %v700_v58, %v698_v59  ;;  %v786_v7 = vperm.slane %v687_v55, %v1527_v47 }
 0x387   :  { %v822_v3 = vsel %vm811_vm4, %v1555_v54, 0.0  ;;  %vm873_vm4 = vcmask 7168  }
 0x388   :  { %v788_v6 = vperm.slane %v715_v60, %v1527_v47  ;;  %830 = vadd.xlane.f32.xlu2 %v822_v3  ;;  %vm813_vm5 = vcmp.eq.s32.totalorder %v1527_v47, %v715_v60  ;;  %v787_v9 = vperm.slane %v701_v0, %v1527_v47  ;;  %vm812_vm8 = vcmp.eq.s32.totalorder %v1527_v47, %v701_v0 }
 0x389   :  { %v824_v10 = vsel %vm813_vm5, %v1555_v54, 0.0  ;;  %v823_v12 = vsel %vm812_vm8, %v1555_v54, 0.0 }
 0x38a   :  { %834 = vadd.xlane.f32.xlu1 %v824_v10  ;;  %832 = vadd.xlane.f32.xlu0 %v823_v12  ;;  %v795_v14 = vsel %vm794_vm6, %v787_v9, %v786_v7 }
 0x38b   :  { %v739_v15 = vpop.xlane.xlu1 %738  ;;  %v797_v4 = vsel %vm796_vm7, %v788_v6, %v795_v14  ;;  %v725_v18 = vpop.xlane.xlu0 %724 }
 0x38c   :  { %v753_v56 = vpop.xlane.xlu2 %752  ;;  %v740_v19 = vcvt.f32.s32 %v739_v15  ;;  %v726_v21 = vcvt.f32.s32 %v725_v18 }
 0x38d   :  { %v754_v17 = vcvt.f32.s32 %v753_v56 }
 0x38e   :  { %v743_v23 = vadd.s32 %v742_v16, %v740_v19  ;;  %v729_v26 = vadd.s32 %v728_v20, %v726_v21 }
 0x38f   :  { %v757_v22 = vadd.s32 %v756_v2, %v754_v17 }
 0x390   :  { %v790_v5 = vperm.slane %v743_v23, %v1527_v47  ;;  %vm815_vm11 = vcmp.eq.s32.totalorder %v1527_v47, %v743_v23  ;;  %v789_v8 = vperm.slane %v729_v26, %v1527_v47  ;;  %vm814_vm13 = vcmp.eq.s32.totalorder %v1527_v47, %v729_v26 }
 0x391   :  { %vm816_vm10 = vcmp.eq.s32.totalorder %v1527_v47, %v757_v22  ;;  %v826_v13 = vsel %vm815_vm11, %v1555_v54, 0.0  ;;  %v825_v28 = vsel %vm814_vm13, %v1555_v54, 0.0  ;;  %v791_v41 = vperm.slane %v757_v22, %v1527_v47 }
 0x392   :  { %v827_v27 = vsel %vm816_vm10, %v1555_v54, 0.0  ;;  %838 = vadd.xlane.f32.xlu0 %v826_v13  ;;  %836 = vadd.xlane.f32.xlu2 %v825_v28  ;;  %v799_v30 = vsel %vm798_vm9, %v789_v8, %v797_v4 }
 0x393   :  { %840 = vadd.xlane.f32.xlu1 %v827_v27  ;;  %v781_v29 = vpop.xlane.xlu1 %780  ;;  %v767_v32 = vpop.xlane.xlu0 %766  ;;  %v801_v37 = vsel %vm800_vm12, %v790_v5, %v799_v30 }
 0x394   :  { %v782_v61 = vcvt.f32.s32 %v781_v29  ;;  %v768_v38 = vcvt.f32.s32 %v767_v32  ;;  %v803_v1 = vsel %vm802_vm14, %v791_v41, %v801_v37 }
 0x396   :  { %v785_v39 = vadd.s32 %v784_v31, %v782_v61  ;;  %v771_v40 = vadd.s32 %v770_v33, %v768_v38 }
 0x398   :  { %v793_v42 = vperm.slane %v785_v39, %v1527_v47  ;;  %vm818_vm15 = vcmp.eq.s32.totalorder %v1527_v47, %v785_v39  ;;  %v792_v43 = vperm.slane %v771_v40, %v1527_v47  ;;  %vm817_vm1 = vcmp.eq.s32.totalorder %v1527_v47, %v771_v40 }
 0x399   :  { %v829_v44 = vsel %vm818_vm15, %v1555_v54, 0.0  ;;  %v828_v46 = vsel %vm817_vm1, %v1555_v54, 0.0 }
 0x39a   :  { %844 = vadd.xlane.f32.xlu0 %v829_v44  ;;  %842 = vadd.xlane.f32.xlu2 %v828_v46  ;;  %v805_v48 = vsel %vm804_vm0, %v792_v43, %v803_v1 }
 0x39b   :  { %v807_v36 = vsel %vm806_vm2, %v793_v42, %v805_v48 }
 0x39c   :  { %809 = vst.msk [vmem:[#allocation11] sm:$0xff] %vm808_vm3, %v807_v36 }
 0x39d   :  { %885 = dma.vmem_to_hbm [thread:$0]  %s881_s13, 128, %s883_s3, [#allocation4]  }
 0x3fb   :  { %v831_v50 = vpop.xlane.xlu2 %830 }
 0x3fc   :  { %v854_v34 = vperm.slane %v831_v50, %v1527_v47 }
 0x3fd   :  { %v833_v49 = vpop.xlane.xlu0 %832  ;;  %v835_v51 = vpop.xlane.xlu1 %834 }
 0x3fe   :  { %v855_v52 = vperm.slane %v833_v49, %v1527_v47  ;;  %v856_v53 = vperm.slane %v835_v51, %v1527_v47 }
 0x400   :  { %v862_v35 = vsel %vm794_vm6, %v855_v52, %v854_v34 }
 0x401   :  { %v863_v45 = vsel %vm796_vm7, %v856_v53, %v862_v35 }
 0x405   :  { %v839_v54 = vpop.xlane.xlu0 %838  ;;  %v837_v55 = vpop.xlane.xlu2 %836 }
 0x406   :  { %v857_v57 = vperm.slane %v837_v55, %v1527_v47  ;;  %v858_v58 = vperm.slane %v839_v54, %v1527_v47  ;;  %v841_v60 = vpop.xlane.xlu1 %840 }
 0x407   :  { %v859_v0 = vperm.slane %v841_v60, %v1527_v47 }
 0x408   :  { %v864_v59 = vsel %vm798_vm9, %v857_v57, %v863_v45 }
 0x409   :  { %v865_v62 = vsel %vm800_vm12, %v858_v58, %v864_v59 }
 0x40a   :  { %v866_v9 = vsel %vm802_vm14, %v859_v0, %v865_v62 }
 0x40d   :  { %v845_v63 = vpop.xlane.xlu0 %844  ;;  %v843_v3 = vpop.xlane.xlu2 %842 }
 0x40e   :  { %v861_v6 = vperm.slane %v845_v63, %v1527_v47  ;;  %v860_v7 = vperm.slane %v843_v3, %v1527_v47 }
 0x410   :  { %v867_v10 = vsel %vm804_vm0, %v860_v7, %v866_v9 }
 0x411   :  { %v868_v11 = vsel %vm806_vm2, %v861_v6, %v867_v10 }
 0x412   :  { %v870_v12 = vsel %vm808_vm3, %v868_v11, 0.0 }
 0x413   :  { %871 = vadd.xlane.f32.xlu1 %v870_v12 }
 0x486   :  { %v872_v14 = vpop.xlane.xlu1 %871 }
 0x487   :  { %874 = vst.msk [vmem:[%s1631_s12] sm:$0xff] %vm873_vm4, %v872_v14 }
 0x488   :  { %1241 = dma.done.wait [#allocation4], 128  }
 0x489   :  { %1242 = vsyncadd [#allocation4], 4294967168 }
 0x48a   :  { %1243 = dma.done.wait [#allocation13], 512  }
 0x48b   :  { %1244 = vsyncadd [#allocation13], 4294966784 }
 0x48c   :  { %911 = vsyncpa [#allocation3], 1 }
 0x48d   :  { %912 = vsyncpa [#allocation6], 1 }
 0x48e   :  { %913 = vsyncpa [#allocation9], 1 }
 0x48f   :  { %914 = vsyncpa [#allocation4], 1 }
 0x490   :  { %915 = vsyncpa [#allocation13], 1 }

</bundles_post_ra>
